<compile_context>
chip_gen: v6e
topology: v6e:2x2x1
jax: 0.10.0
libtpu: 0.0.40
codegen_flags: <defaults>
</compile_context>

<pallas_src>
import jax
import jax.numpy as jnp
from jax.experimental import pallas as pl
from jax.experimental.pallas import tpu as pltpu


# ----------------------------------------------------------------------------
# Elementwise compute dtype: bf16 on chips with a bf16 VPU, f32 otherwise.
# ----------------------------------------------------------------------------
def _compute_dtype():
    try:
        kind = jax.devices()[0].device_kind.lower()
    except Exception:
        return jnp.float32
    if any(tag in kind for tag in ("v2", "v3", "v4", "v5")):
        return jnp.float32      # no bf16 VALU -> keep the elementwise tail in f32
    return jnp.bfloat16         # v6e / v7x


# ----------------------------------------------------------------------------
# Pallas kernel: per grid step processes a (Bt, N, 2) tile of point clouds.
# ----------------------------------------------------------------------------
def make_encoder_kernel(cdt):
    f32 = jnp.float32
    bf16 = jnp.bfloat16

    def kernel(x_ref,
               w1_ref, b1_ref,        # PointNetfeat conv1 (2->64), BN folded, f32
               w2p_ref, b2_ref,       # fused [conv2 (64->128) | enc-conv1 pointfeat half]
               w3_ref, b3_ref,        # PointNetfeat conv3 (128->256), BN folded
               wc1g_ref, bc1_ref,     # Encoder conv1 global half (256->128) + bias
               wc2_ref, bc2_ref,      # Encoder conv2 (128->64)
               wf1_ref, bf1_ref,      # fc1 (64->64)
               wf2_ref, bf2_ref,      # fc2 (64->28), padded to 128 lanes
               o_ref):
        bt, n, _ = x_ref.shape

        def act(acc, b_ref):          # post-matmul bias + ReLU in the compute dtype
            return jnp.maximum(acc.astype(cdt) + b_ref[...].astype(cdt), 0)

        x = x_ref[...]                                              # (Bt, N, 2) f32

        # --- PointNetfeat conv1: K=2 is degenerate for the MXU -> two VPU
        # --- broadcast FMAs (kept in f32 on all generations).
        pf = jnp.maximum(x[..., 0:1] * w1_ref[0:1, :]
                         + x[..., 1:2] * w1_ref[1:2, :]
                         + b1_ref[...], 0)                          # (Bt, N, 64) f32
        pf_b = pf.reshape(bt * n, 64).astype(bf16)                  # shared matmul LHS

        # --- Fused matmul: [PointNetfeat conv2 | Encoder conv1 pointfeat half]
        # --- one (Bt*N, 64) @ (64, 256) MXU pass, lane-sliced afterwards.
        fused = jnp.dot(pf_b, w2p_ref[...], preferred_element_type=f32)   # (Bt*N, 256)
        h2 = act(fused[:, :128], b2_ref)                            # (Bt*N, 128) cdt
        pc = fused[:, 128:].astype(cdt)                             # (Bt*N, 128) cdt, bias later

        # --- PointNetfeat conv3 (+BN, no ReLU before the max) and global max pool.
        h3 = (jnp.dot(h2.astype(bf16), w3_ref[...], preferred_element_type=f32)
              .astype(cdt) + b3_ref[...].astype(cdt))               # (Bt*N, 256) cdt
        g = jnp.max(h3.reshape(bt, n, 256), axis=1)                 # (Bt, 256) global feat

        # --- Encoder conv1 on concat([global, pointfeat]) as a split matmul.
        gc = jnp.dot(g.astype(bf16), wc1g_ref[...], preferred_element_type=f32)  # (Bt, 128)
        h4 = jnp.maximum(pc.reshape(bt, n, 128)
                         + gc.astype(cdt)[:, None, :]
                         + bc1_ref[...].astype(cdt), 0)             # (Bt, N, 128) cdt

        # --- Encoder conv2 + max over points.
        h5 = act(jnp.dot(h4.reshape(bt * n, 128).astype(bf16), wc2_ref[...],
                         preferred_element_type=f32), bc2_ref)      # (Bt*N, 64) cdt
        pooled = jnp.max(h5.reshape(bt, n, 64), axis=1)             # (Bt, 64)

        # --- fc head (lane-dense padded output: 28 real cols + 100 zero cols).
        f1 = act(jnp.dot(pooled.astype(bf16), wf1_ref[...],
                         preferred_element_type=f32), bf1_ref)      # (Bt, 64)
        o_ref[...] = (jnp.dot(f1.astype(bf16), wf2_ref[...], preferred_element_type=f32)
                      + bf2_ref[...])                               # (Bt, 128) f32

    return kernel


# ----------------------------------------------------------------------------
# VMEM footprint estimate and batch-tile selection.
# ----------------------------------------------------------------------------
def _footprint_bytes(block_b, n, cdt):
    """Conservative per-grid-step VMEM estimate (activations + padded I/O + weights)."""
    m = block_b * n
    s = jnp.dtype(cdt).itemsize
    # pf(f32) + pf_b(bf16) + fused(f32) + h2 + pc + h3(f32 acc + cdt) + h4 + h5
    act = m * (2432 + 704 * s)
    x_io = block_b * n * 128 * 4 * 2        # (Bt, N, 2) block lane-padded 2->128, double-buffered
    out_io = block_b * 128 * 4 * 2
    weights = 1 << 20                       # ~0.5 MiB of weights, double-buffered + slack
    return act + x_io + out_io + weights


def _choose_block_b(B, n, cdt, budget_bytes=28 << 20):
    cands = sorted({d for d in range(8, B + 1, 8) if B % d == 0} | {B})
    fits = [bb for bb in cands if _footprint_bytes(bb, n, cdt) <= budget_bytes]
    if not fits:
        fits = [min(cands)]
    # Prefer an even grid with >= 2 steps so ("parallel",) shards across both
    # v7x TensorCores; among those, take the largest tile that fits the budget.
    even = [bb for bb in fits if (B // bb) >= 2 and (B // bb) % 2 == 0]
    return max(even) if even else max(fits)


# ----------------------------------------------------------------------------
# Wrapper
# ----------------------------------------------------------------------------
def encoder_pallas(x_bn2, params, block_b=None):
    """x_bn2: (B, N, 2) float32, channels last.  Returns (B, 28) float32."""
    B, N, C = x_bn2.shape
    assert C == 2
    cdt = params["_cdt"]
    if block_b is None:
        block_b = _choose_block_b(B, N, cdt)
    assert B % block_b == 0
    assert block_b == B or block_b % 8 == 0
    grid = (B // block_b,)

    vmem_limit = int(min(max(1.5 * _footprint_bytes(block_b, N, cdt) + (4 << 20),
                             24 << 20), 48 << 20))

    order = ["w1", "b1", "w2p", "b2", "w3", "b3",
             "wc1g", "bc1", "wc2", "bc2", "wf1", "bf1", "wf2", "bf2"]
    # Constant index_map -> weight blocks are never re-fetched across grid steps.
    w_specs = [pl.BlockSpec(params[k].shape, lambda b: (0, 0)) for k in order]
    w_args = [params[k] for k in order]

    out = pl.pallas_call(
        make_encoder_kernel(cdt),
        out_shape=jax.ShapeDtypeStruct((B, 128), jnp.float32),
        grid_spec=pltpu.PrefetchScalarGridSpec(
            num_scalar_prefetch=0,
            grid=grid,
            in_specs=[pl.BlockSpec((block_b, N, 2), lambda b: (b, 0, 0))] + w_specs,
            out_specs=pl.BlockSpec((block_b, 128), lambda b: (b, 0)),
        ),
        compiler_params=pltpu.CompilerParams(
            dimension_semantics=("parallel",),
            vmem_limit_bytes=vmem_limit,
        ),
    )(x_bn2, *w_args)
    return out[:, :28]


# ----------------------------------------------------------------------------
# Parameter construction (deterministic) + eval-mode BatchNorm folding in glue.
# Matmul weights are cast to bf16 AFTER the f32 BN fold; biases stay f32.
# ----------------------------------------------------------------------------
def _fold_bn(w, b, gamma, beta, mean, var, eps=1e-5):
    """Fold eval-mode BatchNorm1d into a preceding 1x1 conv.  w: (Cin, Cout)."""
    scale = gamma / jnp.sqrt(var + eps)
    return w * scale[None, :], (b - mean) * scale + beta


def make_params(key, cdt):
    def dense(key, cin, cout, scale=0.1):
        kw, kb = jax.random.split(key)
        w = scale * jax.random.normal(kw, (cin, cout), jnp.float32)
        b = scale * jax.random.normal(kb, (cout,), jnp.float32)
        return w, b

    def bn(key, c):
        k1, k2, k3, k4 = jax.random.split(key, 4)
        gamma = 1.0 + 0.05 * jax.random.normal(k1, (c,), jnp.float32)
        beta = 0.05 * jax.random.normal(k2, (c,), jnp.float32)
        mean = 0.05 * jax.random.normal(k3, (c,), jnp.float32)
        var = 1.0 + 0.05 * jax.random.uniform(k4, (c,), jnp.float32)
        return gamma, beta, mean, var

    ks = jax.random.split(key, 10)
    # PointNetfeat convs (BatchNorm in eval mode, folded in f32)
    w1, b1 = dense(ks[0], 2, 64);     w1, b1 = _fold_bn(w1, b1, *bn(ks[1], 64))
    w2, b2 = dense(ks[2], 64, 128);   w2, b2 = _fold_bn(w2, b2, *bn(ks[3], 128))
    w3, b3 = dense(ks[4], 128, 256);  w3, b3 = _fold_bn(w3, b3, *bn(ks[5], 256))
    # Encoder conv1 (320->128): split into global(256) and pointfeat(64) halves
    wc1, bc1 = dense(ks[6], 320, 128)
    wc1g, wc1p = wc1[:256], wc1[256:]          # cat([global, pointfeat]) order
    wc2, bc2 = dense(ks[7], 128, 64)
    wf1, bf1 = dense(ks[8], 64, 64)
    wf2, bf2 = dense(ks[9], 64, 28)
    # Pad fc2 to 128 output lanes so the kernel's store is lane-dense.
    wf2p = jnp.zeros((64, 128), jnp.float32).at[:, :28].set(wf2)
    bf2p = jnp.zeros((128,), jnp.float32).at[:28].set(bf2)

    bf16 = jnp.bfloat16
    as2d = lambda v: v.reshape(1, -1)
    # Fuse the two matmuls that share the pointfeat LHS: [conv2 | enc-conv1 pf half].
    w2p = jnp.concatenate([w2, wc1p], axis=1)                      # (64, 256)
    return dict(
        _cdt=cdt,
        # layer 1 stays f32 (computed on the VPU)
        w1=w1, b1=as2d(b1),
        w2p=w2p.astype(bf16), b2=as2d(b2),
        w3=w3.astype(bf16), b3=as2d(b3),
        wc1g=wc1g.astype(bf16), bc1=as2d(bc1),
        wc2=wc2.astype(bf16), bc2=as2d(bc2),
        wf1=wf1.astype(bf16), bf1=as2d(bf1),
        wf2=wf2p.astype(bf16), bf2=as2d(bf2p),
    )


# ----------------------------------------------------------------------------
# Pure-JAX reference mirroring the kernel's numerics (bf16 matmul operands,
# f32 accumulation, identical elementwise compute dtype).
# ----------------------------------------------------------------------------
def encoder_ref(x_bn2, p):
    cdt = p["_cdt"]
    bf = lambda v: v.astype(jnp.bfloat16)
    mm = lambda a, w: jnp.einsum("...c,cd->...d", bf(a), w,
                                 preferred_element_type=jnp.float32)
    act = lambda acc, b: jnp.maximum(acc.astype(cdt) + b.astype(cdt), 0)

    pf = jnp.maximum(x_bn2[..., 0:1] * p["w1"][0:1, :]
                     + x_bn2[..., 1:2] * p["w1"][1:2, :] + p["b1"], 0)   # (B, N, 64) f32
    fused = mm(pf, p["w2p"])                                             # (B, N, 256)
    h2 = act(fused[..., :128], p["b2"])
    pc = fused[..., 128:].astype(cdt)
    h3 = mm(h2, p["w3"]).astype(cdt) + p["b3"].astype(cdt)               # (B, N, 256)
    g = jnp.max(h3, axis=1)                                              # (B, 256)
    gc = mm(g, p["wc1g"])                                                # (B, 128)
    h4 = jnp.maximum(pc + gc.astype(cdt)[:, None, :] + p["bc1"].astype(cdt), 0)
    h5 = act(mm(h4, p["wc2"]), p["bc2"])                                 # (B, N, 64)
    pooled = jnp.max(h5, axis=1)                                         # (B, 64)
    f1 = act(mm(pooled, p["wf1"]), p["bf1"])                             # (B, 64)
    return (mm(f1, p["wf2"]) + p["bf2"])[:, :28]                         # (B, 28)


if __name__ == "__main__":
    B, N = 2, 128   # batch of 2 point clouds, 128 2-D points each

    key = jax.random.PRNGKey(0)
    x = jax.random.normal(key, (B, 2, N), jnp.float32)   # PyTorch layout (B, C=2, n_pts)

    cdt = _compute_dtype()
    params = make_params(jax.random.PRNGKey(42), cdt)

    # Glue: x.view(B, 2, -1) then transpose to channels-last (B, N, 2).
    x_bn2 = jnp.transpose(x.reshape(B, 2, -1), (0, 2, 1))

    out = encoder_pallas(x_bn2, params)
    out = jax.block_until_ready(out)

    ref = encoder_ref(x_bn2, params)
    assert out.shape == (B, 28)
    err = float(jnp.max(jnp.abs(out - ref)))
    # bf16 matmul operands (and bf16 elementwise on v6e/v7x) -> loose tolerance
    assert jnp.allclose(out, ref, atol=2e-2, rtol=2e-2), f"mismatch vs reference (max abs err {err})"

    print("KERNEL_OK")
</pallas_src>

<mosaic_0001>
module attributes {stable_mosaic.version = 11 : i64} {
  func.func @kernel(%arg0: i32, %arg1: memref<2x128x2xf32, #tpu.memory_space<vmem>>, %arg2: memref<2x64xf32, #tpu.memory_space<vmem>>, %arg3: memref<1x64xf32, #tpu.memory_space<vmem>>, %arg4: memref<64x256xbf16, #tpu.memory_space<vmem>>, %arg5: memref<1x128xf32, #tpu.memory_space<vmem>>, %arg6: memref<128x256xbf16, #tpu.memory_space<vmem>>, %arg7: memref<1x256xf32, #tpu.memory_space<vmem>>, %arg8: memref<256x128xbf16, #tpu.memory_space<vmem>>, %arg9: memref<1x128xf32, #tpu.memory_space<vmem>>, %arg10: memref<128x64xbf16, #tpu.memory_space<vmem>>, %arg11: memref<1x64xf32, #tpu.memory_space<vmem>>, %arg12: memref<64x64xbf16, #tpu.memory_space<vmem>>, %arg13: memref<1x64xf32, #tpu.memory_space<vmem>>, %arg14: memref<64x128xbf16, #tpu.memory_space<vmem>>, %arg15: memref<1x128xf32, #tpu.memory_space<vmem>>, %arg16: memref<2x128xf32, #tpu.memory_space<vmem>>) attributes {dimension_semantics = [#tpu.dimension_semantics<parallel>], iteration_bounds = array<i64: 1>, scalar_prefetch = 0 : i64, scratch_operands = 0 : i64, tpu.core_type = #tpu.core_type<tc>, window_params = [{transform_indices = @transform_0, window_bounds = array<i64: 2, 128, 2>}, {pipeline_mode = #tpu.pipeline_mode<synchronous>, transform_indices = @transform_1, window_bounds = array<i64: 2, 64>}, {pipeline_mode = #tpu.pipeline_mode<synchronous>, transform_indices = @transform_2, window_bounds = array<i64: 1, 64>}, {pipeline_mode = #tpu.pipeline_mode<synchronous>, transform_indices = @transform_3, window_bounds = array<i64: 64, 256>}, {pipeline_mode = #tpu.pipeline_mode<synchronous>, transform_indices = @transform_4, window_bounds = array<i64: 1, 128>}, {pipeline_mode = #tpu.pipeline_mode<synchronous>, transform_indices = @transform_5, window_bounds = array<i64: 128, 256>}, {pipeline_mode = #tpu.pipeline_mode<synchronous>, transform_indices = @transform_6, window_bounds = array<i64: 1, 256>}, {pipeline_mode = #tpu.pipeline_mode<synchronous>, transform_indices = @transform_7, window_bounds = array<i64: 256, 128>}, {pipeline_mode = #tpu.pipeline_mode<synchronous>, transform_indices = @transform_8, window_bounds = array<i64: 1, 128>}, {pipeline_mode = #tpu.pipeline_mode<synchronous>, transform_indices = @transform_9, window_bounds = array<i64: 128, 64>}, {pipeline_mode = #tpu.pipeline_mode<synchronous>, transform_indices = @transform_10, window_bounds = array<i64: 1, 64>}, {pipeline_mode = #tpu.pipeline_mode<synchronous>, transform_indices = @transform_11, window_bounds = array<i64: 64, 64>}, {pipeline_mode = #tpu.pipeline_mode<synchronous>, transform_indices = @transform_12, window_bounds = array<i64: 1, 64>}, {pipeline_mode = #tpu.pipeline_mode<synchronous>, transform_indices = @transform_13, window_bounds = array<i64: 64, 128>}, {pipeline_mode = #tpu.pipeline_mode<synchronous>, transform_indices = @transform_14, window_bounds = array<i64: 1, 128>}, {transform_indices = @transform_15, window_bounds = array<i64: 2, 128>}]} {
    %c0 = arith.constant 0 : index
    %c0_0 = arith.constant 0 : index
    %c0_1 = arith.constant 0 : index
    %0 = vector.load %arg1[%c0, %c0_0, %c0_1] : memref<2x128x2xf32, #tpu.memory_space<vmem>>, vector<2x128x2xf32>
    %1 = vector.extract_strided_slice %0 {offsets = [0, 0, 0], sizes = [2, 128, 1], strides = [1, 1, 1]} : vector<2x128x2xf32> to vector<2x128x1xf32>
    %c0_2 = arith.constant 0 : index
    %c0_3 = arith.constant 0 : index
    %2 = vector.load %arg2[%c0_2, %c0_3] : memref<2x64xf32, #tpu.memory_space<vmem>>, vector<1x64xf32>
    %3 = vector.shape_cast %2 : vector<1x64xf32> to vector<1x1x64xf32>
    %4 = vector.broadcast %1 : vector<2x128x1xf32> to vector<2x128x64xf32>
    %5 = vector.broadcast %3 : vector<1x1x64xf32> to vector<2x128x64xf32>
    %6 = arith.mulf %4, %5 : vector<2x128x64xf32>
    %7 = vector.extract_strided_slice %0 {offsets = [0, 0, 1], sizes = [2, 128, 1], strides = [1, 1, 1]} : vector<2x128x2xf32> to vector<2x128x1xf32>
    %c1 = arith.constant 1 : index
    %c0_4 = arith.constant 0 : index
    %8 = vector.load %arg2[%c1, %c0_4] : memref<2x64xf32, #tpu.memory_space<vmem>>, vector<1x64xf32>
    %9 = vector.shape_cast %8 : vector<1x64xf32> to vector<1x1x64xf32>
    %10 = vector.broadcast %7 : vector<2x128x1xf32> to vector<2x128x64xf32>
    %11 = vector.broadcast %9 : vector<1x1x64xf32> to vector<2x128x64xf32>
    %12 = arith.mulf %10, %11 : vector<2x128x64xf32>
    %13 = arith.addf %6, %12 : vector<2x128x64xf32>
    %c0_5 = arith.constant 0 : index
    %c0_6 = arith.constant 0 : index
    %14 = vector.load %arg3[%c0_5, %c0_6] : memref<1x64xf32, #tpu.memory_space<vmem>>, vector<1x64xf32>
    %15 = vector.shape_cast %14 : vector<1x64xf32> to vector<1x1x64xf32>
    %16 = vector.broadcast %15 : vector<1x1x64xf32> to vector<2x128x64xf32>
    %17 = arith.addf %13, %16 : vector<2x128x64xf32>
    %cst = arith.constant 0.000000e+00 : f32
    %18 = vector.broadcast %cst : f32 to vector<2x128x64xf32>
    %19 = arith.maximumf %17, %18 : vector<2x128x64xf32>
    %20 = vector.shape_cast %19 : vector<2x128x64xf32> to vector<256x64xf32>
    %21 = arith.truncf %20 : vector<256x64xf32> to vector<256x64xbf16>
    %c0_7 = arith.constant 0 : index
    %c0_8 = arith.constant 0 : index
    %22 = vector.load %arg4[%c0_7, %c0_8] : memref<64x256xbf16, #tpu.memory_space<vmem>>, vector<64x256xbf16>
    %cst_9 = arith.constant dense<0.000000e+00> : vector<256x256xf32>
    %23 = tpu.matmul %21, %22, %cst_9 {dimension_numbers = #tpu.dot_dimension_numbers<[1], [0], [0], [1], [0, 0, 1, 1], [], []>} : vector<256x64xbf16>, vector<64x256xbf16>, vector<256x256xf32> -> vector<256x256xf32>
    %24 = vector.extract_strided_slice %23 {offsets = [0, 0], sizes = [256, 128], strides = [1, 1]} : vector<256x256xf32> to vector<256x128xf32>
    %25 = arith.truncf %24 : vector<256x128xf32> to vector<256x128xbf16>
    %c0_10 = arith.constant 0 : index
    %c0_11 = arith.constant 0 : index
    %26 = vector.load %arg5[%c0_10, %c0_11] : memref<1x128xf32, #tpu.memory_space<vmem>>, vector<1x128xf32>
    %27 = arith.truncf %26 : vector<1x128xf32> to vector<1x128xbf16>
    %28 = vector.broadcast %27 : vector<1x128xbf16> to vector<256x128xbf16>
    %29 = arith.addf %25, %28 : vector<256x128xbf16>
    %cst_12 = arith.constant 0.000000e+00 : bf16
    %30 = vector.broadcast %cst_12 : bf16 to vector<256x128xbf16>
    %31 = arith.maximumf %29, %30 : vector<256x128xbf16>
    %32 = vector.extract_strided_slice %23 {offsets = [0, 128], sizes = [256, 128], strides = [1, 1]} : vector<256x256xf32> to vector<256x128xf32>
    %33 = arith.truncf %32 : vector<256x128xf32> to vector<256x128xbf16>
    %c0_13 = arith.constant 0 : index
    %c0_14 = arith.constant 0 : index
    %34 = vector.load %arg6[%c0_13, %c0_14] : memref<128x256xbf16, #tpu.memory_space<vmem>>, vector<128x256xbf16>
    %cst_15 = arith.constant dense<0.000000e+00> : vector<256x256xf32>
    %35 = tpu.matmul %31, %34, %cst_15 {dimension_numbers = #tpu.dot_dimension_numbers<[1], [0], [0], [1], [0, 0, 1, 1], [], []>} : vector<256x128xbf16>, vector<128x256xbf16>, vector<256x256xf32> -> vector<256x256xf32>
    %36 = arith.truncf %35 : vector<256x256xf32> to vector<256x256xbf16>
    %c0_16 = arith.constant 0 : index
    %c0_17 = arith.constant 0 : index
    %37 = vector.load %arg7[%c0_16, %c0_17] : memref<1x256xf32, #tpu.memory_space<vmem>>, vector<1x256xf32>
    %38 = arith.truncf %37 : vector<1x256xf32> to vector<1x256xbf16>
    %39 = vector.broadcast %38 : vector<1x256xbf16> to vector<256x256xbf16>
    %40 = arith.addf %36, %39 : vector<256x256xbf16>
    %41 = vector.shape_cast %40 : vector<256x256xbf16> to vector<2x128x256xbf16>
    %cst_18 = arith.constant dense<0xFF80> : vector<2x256xbf16>
    %42 = vector.multi_reduction <maximumf>, %41, %cst_18 [1] : vector<2x128x256xbf16> to vector<2x256xbf16>
    %c0_19 = arith.constant 0 : index
    %c0_20 = arith.constant 0 : index
    %43 = vector.load %arg8[%c0_19, %c0_20] : memref<256x128xbf16, #tpu.memory_space<vmem>>, vector<256x128xbf16>
    %cst_21 = arith.constant dense<0.000000e+00> : vector<2x128xf32>
    %44 = tpu.matmul %42, %43, %cst_21 {dimension_numbers = #tpu.dot_dimension_numbers<[1], [0], [0], [1], [0, 0, 1, 1], [], []>} : vector<2x256xbf16>, vector<256x128xbf16>, vector<2x128xf32> -> vector<2x128xf32>
    %45 = vector.shape_cast %33 : vector<256x128xbf16> to vector<2x128x128xbf16>
    %46 = arith.truncf %44 : vector<2x128xf32> to vector<2x128xbf16>
    %47 = vector.shape_cast %46 : vector<2x128xbf16> to vector<2x1x128xbf16>
    %48 = vector.broadcast %47 : vector<2x1x128xbf16> to vector<2x128x128xbf16>
    %49 = arith.addf %45, %48 : vector<2x128x128xbf16>
    %c0_22 = arith.constant 0 : index
    %c0_23 = arith.constant 0 : index
    %50 = vector.load %arg9[%c0_22, %c0_23] : memref<1x128xf32, #tpu.memory_space<vmem>>, vector<1x128xf32>
    %51 = arith.truncf %50 : vector<1x128xf32> to vector<1x128xbf16>
    %52 = vector.shape_cast %51 : vector<1x128xbf16> to vector<1x1x128xbf16>
    %53 = vector.broadcast %52 : vector<1x1x128xbf16> to vector<2x128x128xbf16>
    %54 = arith.addf %49, %53 : vector<2x128x128xbf16>
    %cst_24 = arith.constant 0.000000e+00 : bf16
    %55 = vector.broadcast %cst_24 : bf16 to vector<2x128x128xbf16>
    %56 = arith.maximumf %54, %55 : vector<2x128x128xbf16>
    %57 = vector.shape_cast %56 : vector<2x128x128xbf16> to vector<256x128xbf16>
    %c0_25 = arith.constant 0 : index
    %c0_26 = arith.constant 0 : index
    %58 = vector.load %arg10[%c0_25, %c0_26] : memref<128x64xbf16, #tpu.memory_space<vmem>>, vector<128x64xbf16>
    %cst_27 = arith.constant dense<0.000000e+00> : vector<256x64xf32>
    %59 = tpu.matmul %57, %58, %cst_27 {dimension_numbers = #tpu.dot_dimension_numbers<[1], [0], [0], [1], [0, 0, 1, 1], [], []>} : vector<256x128xbf16>, vector<128x64xbf16>, vector<256x64xf32> -> vector<256x64xf32>
    %60 = arith.truncf %59 : vector<256x64xf32> to vector<256x64xbf16>
    %c0_28 = arith.constant 0 : index
    %c0_29 = arith.constant 0 : index
    %61 = vector.load %arg11[%c0_28, %c0_29] : memref<1x64xf32, #tpu.memory_space<vmem>>, vector<1x64xf32>
    %62 = arith.truncf %61 : vector<1x64xf32> to vector<1x64xbf16>
    %63 = vector.broadcast %62 : vector<1x64xbf16> to vector<256x64xbf16>
    %64 = arith.addf %60, %63 : vector<256x64xbf16>
    %cst_30 = arith.constant 0.000000e+00 : bf16
    %65 = vector.broadcast %cst_30 : bf16 to vector<256x64xbf16>
    %66 = arith.maximumf %64, %65 : vector<256x64xbf16>
    %67 = vector.shape_cast %66 : vector<256x64xbf16> to vector<2x128x64xbf16>
    %cst_31 = arith.constant dense<0xFF80> : vector<2x64xbf16>
    %68 = vector.multi_reduction <maximumf>, %67, %cst_31 [1] : vector<2x128x64xbf16> to vector<2x64xbf16>
    %c0_32 = arith.constant 0 : index
    %c0_33 = arith.constant 0 : index
    %69 = vector.load %arg12[%c0_32, %c0_33] : memref<64x64xbf16, #tpu.memory_space<vmem>>, vector<64x64xbf16>
    %cst_34 = arith.constant dense<0.000000e+00> : vector<2x64xf32>
    %70 = tpu.matmul %68, %69, %cst_34 {dimension_numbers = #tpu.dot_dimension_numbers<[1], [0], [0], [1], [0, 0, 1, 1], [], []>} : vector<2x64xbf16>, vector<64x64xbf16>, vector<2x64xf32> -> vector<2x64xf32>
    %71 = arith.truncf %70 : vector<2x64xf32> to vector<2x64xbf16>
    %c0_35 = arith.constant 0 : index
    %c0_36 = arith.constant 0 : index
    %72 = vector.load %arg13[%c0_35, %c0_36] : memref<1x64xf32, #tpu.memory_space<vmem>>, vector<1x64xf32>
    %73 = arith.truncf %72 : vector<1x64xf32> to vector<1x64xbf16>
    %74 = vector.broadcast %73 : vector<1x64xbf16> to vector<2x64xbf16>
    %75 = arith.addf %71, %74 : vector<2x64xbf16>
    %cst_37 = arith.constant 0.000000e+00 : bf16
    %76 = vector.broadcast %cst_37 : bf16 to vector<2x64xbf16>
    %77 = arith.maximumf %75, %76 : vector<2x64xbf16>
    %c0_38 = arith.constant 0 : index
    %c0_39 = arith.constant 0 : index
    %78 = vector.load %arg14[%c0_38, %c0_39] : memref<64x128xbf16, #tpu.memory_space<vmem>>, vector<64x128xbf16>
    %cst_40 = arith.constant dense<0.000000e+00> : vector<2x128xf32>
    %79 = tpu.matmul %77, %78, %cst_40 {dimension_numbers = #tpu.dot_dimension_numbers<[1], [0], [0], [1], [0, 0, 1, 1], [], []>} : vector<2x64xbf16>, vector<64x128xbf16>, vector<2x128xf32> -> vector<2x128xf32>
    %c0_41 = arith.constant 0 : index
    %c0_42 = arith.constant 0 : index
    %80 = vector.load %arg15[%c0_41, %c0_42] : memref<1x128xf32, #tpu.memory_space<vmem>>, vector<1x128xf32>
    %81 = vector.broadcast %80 : vector<1x128xf32> to vector<2x128xf32>
    %82 = arith.addf %79, %81 : vector<2x128xf32>
    %c0_43 = arith.constant 0 : index
    %c0_44 = arith.constant 0 : index
    %83 = vector.load %arg16[%c0_43, %c0_44] : memref<2x128xf32, #tpu.memory_space<vmem>>, vector<2x128xf32>
    tpu.vector_store %arg16[%c0_43, %c0_44], %82 {strides = array<i32>} : memref<2x128xf32, #tpu.memory_space<vmem>>, vector<2x128xf32>,
    return
  }
  func.func @transform_0(%arg0: i32) -> (i32, i32, i32) {
    %c0_i32 = arith.constant 0 : i32
    %c0_i32_0 = arith.constant 0 : i32
    %c0_i32_1 = arith.constant 0 : i32
    return %arg0, %c0_i32, %c0_i32_0 : i32, i32, i32
  }
  func.func @transform_1(%arg0: i32) -> (i32, i32) {
    %c0_i32 = arith.constant 0 : i32
    %c0_i32_0 = arith.constant 0 : i32
    %c0_i32_1 = arith.constant 0 : i32
    return %c0_i32, %c0_i32_0 : i32, i32
  }
  func.func @transform_2(%arg0: i32) -> (i32, i32) {
    %c0_i32 = arith.constant 0 : i32
    %c0_i32_0 = arith.constant 0 : i32
    %c0_i32_1 = arith.constant 0 : i32
    return %c0_i32, %c0_i32_0 : i32, i32
  }
  func.func @transform_3(%arg0: i32) -> (i32, i32) {
    %c0_i32 = arith.constant 0 : i32
    %c0_i32_0 = arith.constant 0 : i32
    %c0_i32_1 = arith.constant 0 : i32
    return %c0_i32, %c0_i32_0 : i32, i32
  }
  func.func @transform_4(%arg0: i32) -> (i32, i32) {
    %c0_i32 = arith.constant 0 : i32
    %c0_i32_0 = arith.constant 0 : i32
    %c0_i32_1 = arith.constant 0 : i32
    return %c0_i32, %c0_i32_0 : i32, i32
  }
  func.func @transform_5(%arg0: i32) -> (i32, i32) {
    %c0_i32 = arith.constant 0 : i32
    %c0_i32_0 = arith.constant 0 : i32
    %c0_i32_1 = arith.constant 0 : i32
    return %c0_i32, %c0_i32_0 : i32, i32
  }
  func.func @transform_6(%arg0: i32) -> (i32, i32) {
    %c0_i32 = arith.constant 0 : i32
    %c0_i32_0 = arith.constant 0 : i32
    %c0_i32_1 = arith.constant 0 : i32
    return %c0_i32, %c0_i32_0 : i32, i32
  }
  func.func @transform_7(%arg0: i32) -> (i32, i32) {
    %c0_i32 = arith.constant 0 : i32
    %c0_i32_0 = arith.constant 0 : i32
    %c0_i32_1 = arith.constant 0 : i32
    return %c0_i32, %c0_i32_0 : i32, i32
  }
  func.func @transform_8(%arg0: i32) -> (i32, i32) {
    %c0_i32 = arith.constant 0 : i32
    %c0_i32_0 = arith.constant 0 : i32
    %c0_i32_1 = arith.constant 0 : i32
    return %c0_i32, %c0_i32_0 : i32, i32
  }
  func.func @transform_9(%arg0: i32) -> (i32, i32) {
    %c0_i32 = arith.constant 0 : i32
    %c0_i32_0 = arith.constant 0 : i32
    %c0_i32_1 = arith.constant 0 : i32
    return %c0_i32, %c0_i32_0 : i32, i32
  }
  func.func @transform_10(%arg0: i32) -> (i32, i32) {
    %c0_i32 = arith.constant 0 : i32
    %c0_i32_0 = arith.constant 0 : i32
    %c0_i32_1 = arith.constant 0 : i32
    return %c0_i32, %c0_i32_0 : i32, i32
  }
  func.func @transform_11(%arg0: i32) -> (i32, i32) {
    %c0_i32 = arith.constant 0 : i32
    %c0_i32_0 = arith.constant 0 : i32
    %c0_i32_1 = arith.constant 0 : i32
    return %c0_i32, %c0_i32_0 : i32, i32
  }
  func.func @transform_12(%arg0: i32) -> (i32, i32) {
    %c0_i32 = arith.constant 0 : i32
    %c0_i32_0 = arith.constant 0 : i32
    %c0_i32_1 = arith.constant 0 : i32
    return %c0_i32, %c0_i32_0 : i32, i32
  }
  func.func @transform_13(%arg0: i32) -> (i32, i32) {
    %c0_i32 = arith.constant 0 : i32
    %c0_i32_0 = arith.constant 0 : i32
    %c0_i32_1 = arith.constant 0 : i32
    return %c0_i32, %c0_i32_0 : i32, i32
  }
  func.func @transform_14(%arg0: i32) -> (i32, i32) {
    %c0_i32 = arith.constant 0 : i32
    %c0_i32_0 = arith.constant 0 : i32
    %c0_i32_1 = arith.constant 0 : i32
    return %c0_i32, %c0_i32_0 : i32, i32
  }
  func.func @transform_15(%arg0: i32) -> (i32, i32) {
    %c0_i32 = arith.constant 0 : i32
    %c0_i32_0 = arith.constant 0 : i32
    return %arg0, %c0_i32 : i32, i32
  }
}

</mosaic_0001>

<bundles_post_ra>
// kernel: tpu_custom_call.1
= control target key start
LH: loop header
LB: loop body
LE: loop exit
PB: predicated region body
PF: predicated region fallthrough
CT: control target
= control target key end

     0   :  { %20 = vsyncpa [#allocation3], 0  ;;  %s3511_s0 = inlined_call_operand.vmem [shape: f32[2,128,2], index: 0, kind: input, shape index: {}]   ;;  %s3512_s1 = inlined_call_operand.vmem [shape: f32[2,64], index: 1, kind: input, shape index: {}]   ;;  %s3513_s2 = inlined_call_operand.vmem [shape: f32[1,64], index: 2, kind: input, shape index: {}]   ;;  %s3514_s3 = inlined_call_operand.vmem [shape: bf16[64,256], index: 3, kind: input, shape index: {}]   ;;  %s3515_s4 = inlined_call_operand.vmem [shape: f32[1,128], index: 4, kind: input, shape index: {}]   ;;  %s3516_s5 = inlined_call_operand.vmem [shape: bf16[128,256], index: 5, kind: input, shape index: {}]   ;;  %s3517_s6 = inlined_call_operand.vmem [shape: f32[1,256], index: 6, kind: input, shape index: {}]   ;;  %s3518_s7 = inlined_call_operand.vmem [shape: bf16[256,128], index: 7, kind: input, shape index: {}]   ;;  %s3519_s8 = inlined_call_operand.vmem [shape: f32[1,128], index: 8, kind: input, shape index: {}]   ;;  %s3520_s9 = inlined_call_operand.vmem [shape: bf16[128,64], index: 9, kind: input, shape index: {}]   ;;  %s3521_s10 = inlined_call_operand.vmem [shape: f32[1,64], index: 10, kind: input, shape index: {}]   ;;  %s3522_s11 = inlined_call_operand.vmem [shape: bf16[64,64], index: 11, kind: input, shape index: {}]   ;;  %s3523_s12 = inlined_call_operand.vmem [shape: f32[1,64], index: 12, kind: input, shape index: {}]   ;;  %s3524_s13 = inlined_call_operand.hbm [shape: bf16[64,128], index: 13, kind: input, shape index: {}]   ;;  %s3525_s14 = inlined_call_operand.vmem [shape: f32[1,128], index: 14, kind: input, shape index: {}]   ;;  %s3526_s15 = inlined_call_operand.hbm [shape: f32[2,128], index: 15, kind: output, shape index: {}]  }
   0x1   :  { %21 = vsyncpa [#allocation4], 0  ;;  %s2599_s18 = smov [#allocation2]  }
   0x2   :  { %s53_s19 = sshll.u32 %s2599_s18, 4  ;;  %s54_s19 = int_to_ptr.vmem [resolvable:$true] %s53_s19 }
   0x3   :  { %s2563_s20 = scalar_lea.vmem %s54_s19, 512  ;;  %p2568_p1 = scmp.lt.s32.totalorder %s54_s19, %s54_s19 }
   0x4   :  { %p2564_p0 = scmp.ne.s32.totalorder %s54_s19, %s2563_s20  ;;  %p2569_p2 = scmp.lt.s32.totalorder %s2563_s20, %s2563_s20 }
   0x6   :  { %p2570_p3 = por %p2569_p2, %p2568_p1 }
   0x8   :  { %p2571_p4 = pnand %p2570_p3, %p2564_p0 }
   0xa   :  { %2574 = shalt.err (!%p2571_p4)
}
   0xb   :  { %s2600_s21 = smov 64   ;;  %s2601_s22 = smov 4  }
   0xc   :  { %59 = dma.hbm_to_vmem [thread:$0]  %s3524_s13, 512, %s54_s19, [#allocation3], %s2600_s21, %s2600_s21, %s2601_s22  }
   0xd   :  { %2595 = dma.done.wait [#allocation3], 512  }
   0xe   :  { %2596 = vsyncadd [#allocation3], 4294966784  ;;  %v2602_v0 = vmov 1   ;;  %v3527_v1 = vmov 0   ;;  %v67_v2 = vld [vmem:[%s3511_s0] sm:$0xff]  ;;  %v68_v3 = vld [vmem:[%s3511_s0 + $0x8] sm:$0xff] }
   0xf   :  { %2447 = vset.pattern.permute.xlu1 %v2602_v0  ;;  %2446 = vset.pattern.permute.xlu0 %v3527_v1  ;;  %v69_v4 = vld [vmem:[%s3511_s0 + $0x10] sm:$0xff]  ;;  %v70_v5 = vld [vmem:[%s3511_s0 + $0x18] sm:$0xff]  ;;  %v2490_v8 = vld [vmem:[%s3514_s3 + $0x24] ss:$8 sps:$4 sm:$0xff]   ;;  %vm628_vm0 = vcmask 523264   ;;  %vm1432_vm1 = vcmask 1041409  }
  0x10   :  { %709 = vmatprep.mubr.bf16.mxu0 %v3527_v1  ;;  %1071 = vmatprep.mubr.bf16.mxu1 %v3527_v1  ;;  %v2487_v6 = vld [vmem:[%s3514_s3 + $0x34] ss:$8 sps:$4 sm:$0xff]   ;;  %v2489_v7 = vld [vmem:[%s3514_s3 + $0x30] ss:$8 sps:$4 sm:$0xff]   ;;  %v2492_v9 = vld [vmem:[%s3514_s3 + $0x20] ss:$8 sps:$4 sm:$0xff]  }
  0x11   :  { %298 = vperm.xlu1 %2447, %v67_v2   ;;  %102 = vperm.xlu0 %2446, %v67_v2   ;;  %v2493_v10 = vld [vmem:[%s3514_s3 + $0x14] ss:$8 sps:$4 sm:$0xff]   ;;  %v2495_v12 = vld [vmem:[%s3514_s3 + $0x10] ss:$8 sps:$4 sm:$0xff]   ;;  %v2496_v13 = vld [vmem:[%s3514_s3 + $0x4] ss:$8 sps:$4 sm:$0xff]  }
  0x12   :  { %685 = vmatprep.subr.bf16.mxu0 %v2487_v6  ;;  %v73_v11 = vld [vmem:[%s3511_s0 + $0x30] sm:$0xff]  ;;  %v71_v14 = vld [vmem:[%s3511_s0 + $0x20] sm:$0xff]  ;;  %v72_v16 = vld [vmem:[%s3511_s0 + $0x28] sm:$0xff]  ;;  %vm2606_vm2 = vmmov 0   ;;  %s2607_s29 = smov [#allocation5]  }
  0x13   :  { %686 = vmatpush1.bf16.msra.mxu0 %v2489_v7  ;;  %v2498_v15 = vld [vmem:[%s3514_s3] ss:$8 sps:$4 sm:$0xff]   ;;  %v74_v18 = vld [vmem:[%s3511_s0 + $0x38] sm:$0xff]  ;;  %v77_v19 = vld [vmem:[%s3511_s0 + $0x50] sm:$0xff] }
  0x14   :  { %687 = vmatprep.subr.bf16.mxu0 %v2490_v8  ;;  %v76_v17 = vld [vmem:[%s3511_s0 + $0x48] sm:$0xff]  ;;  %v75_v20 = vld [vmem:[%s3511_s0 + $0x40] sm:$0xff]  ;;  %v81_v21 = vld [vmem:[%s3511_s0 + $0x70] sm:$0xff] }
  0x15   :  { %302 = vperm.xlu1 %2447, %v68_v3   ;;  %107 = vperm.xlu0 %2446, %v68_v3   ;;  %v80_v22 = vld [vmem:[%s3511_s0 + $0x68] sm:$0xff]  ;;  %v78_v24 = vld [vmem:[%s3511_s0 + $0x58] sm:$0xff]  ;;  %v85_v25 = vld [vmem:[%s3511_s0 + $0x90] sm:$0xff] }
  0x16   :  { %v84_v23 = vld [vmem:[%s3511_s0 + $0x88] sm:$0xff]  ;;  %v79_v26 = vld [vmem:[%s3511_s0 + $0x60] sm:$0xff]  ;;  %v89_v27 = vld [vmem:[%s3511_s0 + $0xb0] sm:$0xff] }
  0x17   :  { %688 = vmatpush1.bf16.msra.mxu0 %v2492_v9  ;;  %v88_v28 = vld [vmem:[%s3511_s0 + $0xa8] sm:$0xff]  ;;  %v82_v29 = vld [vmem:[%s3511_s0 + $0x78] sm:$0xff]  ;;  %v93_v31 = vld [vmem:[%s3511_s0 + $0xd0] sm:$0xff] }
  0x18   :  { %689 = vmatprep.subr.bf16.mxu0 %v2493_v10  ;;  %v2800_v30 = vld [vmem:[%s3511_s0 + $0xc8] sm:$0xff]  ;;  %v83_v32 = vld [vmem:[%s3511_s0 + $0x80] sm:$0xff]  ;;  %v97_v34 = vld [vmem:[%s3511_s0 + $0xf0] sm:$0xff] }
  0x19   :  { %2448 = vset.pattern.permute.xlu1 %v3527_v1  ;;  %112 = vperm.xlu0 %2446, %v69_v4   ;;  %v2817_v33 = vld [vmem:[%s3511_s0 + $0xe8] sm:$0xff]  ;;  %v86_v35 = vld [vmem:[%s3511_s0 + $0x98] sm:$0xff]  ;;  %v87_v36 = vld [vmem:[%s3511_s0 + $0xa0] sm:$0xff] }
  0x1a   :  { %117 = vperm.xlu1 %2448, %v70_v5   ;;  %v2838_v37 = vld [vmem:[%s3512_s1 + $0x1] ss:$0 sm:$0xff]  ;;  %v2843_v38 = vld [vmem:[%s3512_s1] ss:$0 sm:$0xff]  ;;  %v90_v44 = vld [vmem:[%s3511_s0 + $0xb8] sm:$0xff] }
  0x1b   :  { %690 = vmatpush1.bf16.msra.mxu0 %v2495_v12  ;;  %v2853_v45 = vld [vmem:[%s3513_s2] ss:$0 sm:$0xff] }
  0x1c   :  { %691 = vmatprep.subr.bf16.mxu0 %v2496_v13  ;;  %v91_v60 = vld [vmem:[%s3511_s0 + $0xc0] sm:$0xff] }
  0x1d   :  { %2449 = vset.pattern.permute.xlu0 %v2602_v0 }
  0x1e   :  { %2450 = vset.pattern.permute.xlu1 %v2602_v0  ;;  %306 = vperm.xlu0 %2449, %v69_v4  }
  0x1f   :  { %310 = vperm.xlu1 %2450, %v70_v5   ;;  %692 = vmatpush1.bf16.msra.mxu0 %v2498_v15 }
  0x22   :  { %322 = vperm.xlu0 %2449, %v73_v11  }
  0x23   :  { %2451 = vset.pattern.permute.xlu1 %v3527_v1 }
  0x24   :  { %122 = vperm.xlu1 %2451, %v71_v14  }
  0x26   :  { %2454 = vset.pattern.permute.xlu0 %v3527_v1 }
  0x27   :  { %127 = vperm.xlu0 %2454, %v72_v16  }
  0x28   :  { %2452 = vset.pattern.permute.xlu1 %v2602_v0 }
  0x29   :  { %314 = vperm.xlu1 %2452, %v71_v14  }
  0x2b   :  { %132 = vperm.xlu0 %2454, %v73_v11  }
  0x2d   :  { %318 = vperm.xlu1 %2452, %v72_v16  }
  0x2f   :  { %147 = vperm.xlu0 %2454, %v76_v17  }
  0x31   :  { %2453 = vset.pattern.permute.xlu1 %v3527_v1 }
  0x32   :  { %137 = vperm.xlu1 %2453, %v74_v18  }
  0x33   :  { %152 = vperm.xlu0 %2454, %v77_v19  }
  0x36   :  { %2455 = vset.pattern.permute.xlu1 %v2602_v0 }
  0x37   :  { %326 = vperm.xlu1 %2455, %v74_v18   ;;  %2459 = vset.pattern.permute.xlu0 %v2602_v0  ;;  %v94_v18 = vld [vmem:[%s3511_s0 + $0xd8] sm:$0xff] }
  0x38   :  { %338 = vperm.xlu0 %2459, %v77_v19  }
  0x3b   :  { %2456 = vset.pattern.permute.xlu1 %v3527_v1 }
  0x3c   :  { %142 = vperm.xlu1 %2456, %v75_v20   ;;  %354 = vperm.xlu0 %2459, %v81_v21  }
  0x40   :  { %2457 = vset.pattern.permute.xlu1 %v2602_v0  ;;  %2464 = vset.pattern.permute.xlu0 %v3527_v1 }
  0x41   :  { %330 = vperm.xlu1 %2457, %v75_v20   ;;  %167 = vperm.xlu0 %2464, %v80_v22  }
  0x45   :  { %334 = vperm.xlu1 %2457, %v76_v17   ;;  %172 = vperm.xlu0 %2464, %v81_v21  }
  0x49   :  { %2458 = vset.pattern.permute.xlu1 %v3527_v1  ;;  %187 = vperm.xlu0 %2464, %v84_v23  }
  0x4a   :  { %157 = vperm.xlu1 %2458, %v78_v24  }
  0x4d   :  { %192 = vperm.xlu0 %2464, %v85_v25  }
  0x4e   :  { %2460 = vset.pattern.permute.xlu1 %v2602_v0 }
  0x4f   :  { %342 = vperm.xlu1 %2460, %v78_v24  }
  0x51   :  { %2469 = vset.pattern.permute.xlu0 %v2602_v0 }
  0x52   :  { %370 = vperm.xlu0 %2469, %v85_v25  }
  0x53   :  { %2461 = vset.pattern.permute.xlu1 %v3527_v1 }
  0x54   :  { %162 = vperm.xlu1 %2461, %v79_v26  }
  0x56   :  { %386 = vperm.xlu0 %2469, %v89_v27  }
  0x58   :  { %2462 = vset.pattern.permute.xlu1 %v2602_v0 }
  0x59   :  { %346 = vperm.xlu1 %2462, %v79_v26  }
  0x5a   :  { %2474 = vset.pattern.permute.xlu0 %v3527_v1 }
  0x5b   :  { %207 = vperm.xlu0 %2474, %v88_v28  }
  0x5d   :  { %350 = vperm.xlu1 %2462, %v80_v22  }
  0x5f   :  { %212 = vperm.xlu0 %2474, %v89_v27  }
  0x61   :  { %2463 = vset.pattern.permute.xlu1 %v3527_v1 }
  0x62   :  { %177 = vperm.xlu1 %2463, %v82_v29  }
  0x63   :  { %227 = vperm.xlu0 %2474, %v2800_v30  }
  0x66   :  { %2465 = vset.pattern.permute.xlu1 %v2602_v0 }
  0x67   :  { %358 = vperm.xlu1 %2465, %v82_v29   ;;  %2479 = vset.pattern.permute.xlu0 %v2602_v0 }
  0x68   :  { %402 = vperm.xlu0 %2479, %v93_v31  }
  0x6b   :  { %2466 = vset.pattern.permute.xlu1 %v3527_v1 }
  0x6c   :  { %182 = vperm.xlu1 %2466, %v83_v32   ;;  %2480 = vset.pattern.permute.xlu0 %v3527_v1 }
  0x6d   :  { %232 = vperm.xlu0 %2480, %v93_v31  }
  0x70   :  { %2467 = vset.pattern.permute.xlu1 %v2602_v0 }
  0x71   :  { %362 = vperm.xlu1 %2467, %v83_v32   ;;  %247 = vperm.xlu0 %2480, %v2817_v33   ;;  %v95_v32 = vld [vmem:[%s3511_s0 + $0xe0] sm:$0xff] }
  0x75   :  { %366 = vperm.xlu1 %2467, %v84_v23   ;;  %252 = vperm.xlu0 %2480, %v97_v34  }
  0x79   :  { %2468 = vset.pattern.permute.xlu1 %v3527_v1  ;;  %2485 = vset.pattern.permute.xlu0 %v2602_v0 }
  0x7a   :  { %197 = vperm.xlu1 %2468, %v86_v35   ;;  %418 = vperm.xlu0 %2485, %v97_v34  }
  0x7e   :  { %2470 = vset.pattern.permute.xlu1 %v2602_v0 }
  0x7f   :  { %374 = vperm.xlu1 %2470, %v86_v35  }
  0x83   :  { %2471 = vset.pattern.permute.xlu1 %v3527_v1 }
  0x84   :  { %202 = vperm.xlu1 %2471, %v87_v36  }
  0x88   :  { %2472 = vset.pattern.permute.xlu1 %v2602_v0 }
  0x89   :  { %378 = vperm.xlu1 %2472, %v87_v36  }
  0x8c   :  { %v299_v39 = vpop.permute.xlu1 %298  ;;  %v103_v40 = vpop.permute.xlu0 %102 }
  0x8d   :  { %v429_v41 = vmul.f32 %v2838_v37, %v299_v39  ;;  %v264_v42 = vmul.f32 %v2843_v38, %v103_v40  ;;  %382 = vperm.xlu1 %2472, %v88_v28  }
  0x8f   :  { %v461_v43 = vadd.f32 %v429_v41, %v264_v42 }
  0x90   :  { %v303_v46 = vpop.permute.xlu1 %302  ;;  %v108_v47 = vpop.permute.xlu0 %107 }
  0x91   :  { %v430_v48 = vmul.f32 %v2838_v37, %v303_v46  ;;  %v265_v49 = vmul.f32 %v2843_v38, %v108_v47  ;;  %2473 = vset.pattern.permute.xlu1 %v3527_v1  ;;  %v500_v50 = vadd.f32 %v2853_v45, %v461_v43 }
  0x92   :  { %217 = vperm.xlu1 %2473, %v90_v44  }
  0x93   :  { %v462_v51 = vadd.f32 %v430_v48, %v265_v49  ;;  %v532_v55 = vmax.f32 %v500_v50, 0.0 }
  0x94   :  { %v113_v52 = vpop.permute.xlu0 %112 }
  0x95   :  { %v501_v53 = vadd.f32 %v2853_v45, %v462_v51  ;;  %v118_v54 = vpop.permute.xlu1 %117  ;;  %v266_v57 = vmul.f32 %v2843_v38, %v113_v52 }
  0x96   :  { %2475 = vset.pattern.permute.xlu1 %v2602_v0  ;;  %v267_v63 = vmul.f32 %v2843_v38, %v118_v54  ;;  %v98_v54 = vld [vmem:[%s3511_s0 + $0xf8] sm:$0xff] }
  0x97   :  { %v533_v56 = vmax.f32 %v501_v53, 0.0  ;;  %390 = vperm.xlu1 %2475, %v90_v44  }
  0x99   :  { %v564_v58 = vpack.c.bf16 %v533_v56, %v532_v55  ;;  %v307_v59 = vpop.permute.xlu0 %306 }
  0x9a   :  { %v311_v61 = vpop.permute.xlu1 %310  ;;  %v431_v62 = vmul.f32 %v2838_v37, %v307_v59 }
  0x9b   :  { %v432_v2 = vmul.f32 %v2838_v37, %v311_v61  ;;  %2476 = vset.pattern.permute.xlu1 %v3527_v1  ;;  %2241 = vmatmul.mubr.msk.bf16.vlgmr.msra.gmra.mxu0 %vm628_vm0, %v564_v58  ;;  %v2499_v61 = vld [vmem:[%s3516_s5 + $0x74] ss:$8 sps:$4 sm:$0xff]  }
  0x9c   :  { %v463_v3 = vadd.f32 %v431_v62, %v266_v57  ;;  %222 = vperm.xlu1 %2476, %v91_v60   ;;  %719 = vmatprep.mubr.bf16.mxu0 %v3527_v1 }
  0x9d   :  { %v464_v4 = vadd.f32 %v432_v2, %v267_v63  ;;  %v323_v6 = vpop.permute.xlu0 %322  ;;  %v2501_v2 = vld [vmem:[%s3516_s5 + $0x70] ss:$8 sps:$4 sm:$0xff]   ;;  %1039 = vmatprep.subr.bf16.mxu1 %v2499_v61 }
  0x9e   :  { %v502_v5 = vadd.f32 %v2853_v45, %v463_v3  ;;  %v435_v23 = vmul.f32 %v2838_v37, %v323_v6  ;;  %1040 = vmatpush1.bf16.msra.mxu1 %v2501_v2  ;;  %v2502_v6 = vld [vmem:[%s3516_s5 + $0x64] ss:$8 sps:$4 sm:$0xff]  }
  0x9f   :  { %v503_v7 = vadd.f32 %v2853_v45, %v464_v4  ;;  %v123_v8 = vpop.permute.xlu1 %122  ;;  %1041 = vmatprep.subr.bf16.mxu1 %v2502_v6 }
  0xa0   :  { %v534_v9 = vmax.f32 %v502_v5, 0.0  ;;  %2477 = vset.pattern.permute.xlu1 %v2602_v0  ;;  %v268_v14 = vmul.f32 %v2843_v38, %v123_v8  ;;  %v2504_v8 = vld [vmem:[%s3516_s5 + $0x60] ss:$8 sps:$4 sm:$0xff]  }
  0xa1   :  { %v535_v10 = vmax.f32 %v503_v7, 0.0  ;;  %394 = vperm.xlu1 %2477, %v91_v60  }
  0xa2   :  { %v128_v13 = vpop.permute.xlu0 %127  ;;  %1042 = vmatpush1.bf16.msra.mxu1 %v2504_v8 }
  0xa3   :  { %v565_v11 = vpack.c.bf16 %v535_v10, %v534_v9  ;;  %v269_v17 = vmul.f32 %v2843_v38, %v128_v13 }
  0xa4   :  { %v315_v12 = vpop.permute.xlu1 %314 }
  0xa5   :  { %v433_v15 = vmul.f32 %v2838_v37, %v315_v12  ;;  %398 = vperm.xlu1 %2477, %v2800_v30   ;;  %2242 = vmatmul.mubr.msk.bf16.gmra.mxu0 %vm628_vm0, %v565_v11  ;;  %v2505_v12 = vld [vmem:[%s3516_s5 + $0x54] ss:$8 sps:$4 sm:$0xff]  }
  0xa6   :  { %729 = vmatprep.mubr.bf16.mxu0 %v3527_v1  ;;  %v133_v20 = vpop.permute.xlu0 %132  ;;  %1043 = vmatprep.subr.bf16.mxu1 %v2505_v12 }
  0xa7   :  { %v465_v16 = vadd.f32 %v433_v15, %v268_v14  ;;  %v270_v25 = vmul.f32 %v2843_v38, %v133_v20  ;;  %v2507_v14 = vld [vmem:[%s3516_s5 + $0x50] ss:$8 sps:$4 sm:$0xff]   ;;  %v2508_v15 = vld [vmem:[%s3516_s5 + $0x44] ss:$8 sps:$4 sm:$0xff]   ;;  %v2510_v20 = vld [vmem:[%s3516_s5 + $0x40] ss:$8 sps:$4 sm:$0xff]  }
  0xa8   :  { %v319_v19 = vpop.permute.xlu1 %318  ;;  %1044 = vmatpush1.bf16.msra.mxu1 %v2507_v14 }
  0xa9   :  { %v434_v21 = vmul.f32 %v2838_v37, %v319_v19  ;;  %2478 = vset.pattern.permute.xlu1 %v3527_v1  ;;  %v504_v22 = vadd.f32 %v2853_v45, %v465_v16  ;;  %v467_v30 = vadd.f32 %v435_v23, %v270_v25  ;;  %1045 = vmatprep.subr.bf16.mxu1 %v2508_v15 }
  0xaa   :  { %237 = vperm.xlu1 %2478, %v94_v18   ;;  %v148_v41 = vpop.permute.xlu0 %147 }
  0xab   :  { %v466_v24 = vadd.f32 %v434_v21, %v269_v17  ;;  %v536_v28 = vmax.f32 %v504_v22, 0.0  ;;  %v506_v39 = vadd.f32 %v2853_v45, %v467_v30  ;;  %v273_v53 = vmul.f32 %v2843_v38, %v148_v41  ;;  %v2511_v21 = vld [vmem:[%s3516_s5 + $0x34] ss:$8 sps:$4 sm:$0xff]  }
  0xac   :  { %1046 = vmatpush1.bf16.msra.mxu1 %v2510_v20 }
  0xad   :  { %v505_v26 = vadd.f32 %v2853_v45, %v466_v24  ;;  %v138_v27 = vpop.permute.xlu1 %137  ;;  %v538_v43 = vmax.f32 %v506_v39, 0.0  ;;  %v2513_v24 = vld [vmem:[%s3516_s5 + $0x30] ss:$8 sps:$4 sm:$0xff]   ;;  %1047 = vmatprep.subr.bf16.mxu1 %v2511_v21 }
  0xae   :  { %2481 = vset.pattern.permute.xlu1 %v2602_v0  ;;  %v271_v35 = vmul.f32 %v2843_v38, %v138_v27  ;;  %v153_v47 = vpop.permute.xlu0 %152  ;;  %v2514_v27 = vld [vmem:[%s3516_s5 + $0x24] ss:$8 sps:$4 sm:$0xff]  }
  0xaf   :  { %v537_v29 = vmax.f32 %v505_v26, 0.0  ;;  %406 = vperm.xlu1 %2481, %v94_v18   ;;  %v274_v59 = vmul.f32 %v2843_v38, %v153_v47  ;;  %v2519_v47 = vld [vmem:[%s3516_s5 + $0x10] ss:$8 sps:$4 sm:$0xff]  }
  0xb0   :  { %1048 = vmatpush1.bf16.msra.mxu1 %v2513_v24 }
  0xb1   :  { %v566_v31 = vpack.c.bf16 %v537_v29, %v536_v28  ;;  %1049 = vmatprep.subr.bf16.mxu1 %v2514_v27 }
  0xb2   :  { %v327_v34 = vpop.permute.xlu1 %326 }
  0xb3   :  { %v436_v36 = vmul.f32 %v2838_v37, %v327_v34  ;;  %2482 = vset.pattern.permute.xlu1 %v3527_v1  ;;  %2243 = vmatmul.mubr.msk.bf16.gmra.mxu0 %vm628_vm0, %v566_v31  ;;  %v339_v56 = vpop.permute.xlu0 %338 }
  0xb4   :  { %242 = vperm.xlu1 %2482, %v95_v32   ;;  %739 = vmatprep.mubr.bf16.mxu0 %v3527_v1  ;;  %v439_v60 = vmul.f32 %v2838_v37, %v339_v56 }
  0xb5   :  { %v468_v40 = vadd.f32 %v436_v36, %v271_v35  ;;  %v2516_v36 = vld [vmem:[%s3516_s5 + $0x20] ss:$8 sps:$4 sm:$0xff]  }
  0xb6   :  { %v471_v5 = vadd.f32 %v439_v60, %v274_v59  ;;  %1050 = vmatpush1.bf16.msra.mxu1 %v2516_v36 }
  0xb7   :  { %v507_v42 = vadd.f32 %v2853_v45, %v468_v40  ;;  %v143_v44 = vpop.permute.xlu1 %142  ;;  %v355_v16 = vpop.permute.xlu0 %354 }
  0xb8   :  { %2483 = vset.pattern.permute.xlu1 %v2602_v0  ;;  %v272_v50 = vmul.f32 %v2843_v38, %v143_v44  ;;  %v510_v11 = vadd.f32 %v2853_v45, %v471_v5  ;;  %v443_v40 = vmul.f32 %v2838_v37, %v355_v16 }
  0xb9   :  { %v539_v46 = vmax.f32 %v507_v42, 0.0  ;;  %410 = vperm.xlu1 %2483, %v95_v32  }
  0xba   :  { %v542_v18 = vmax.f32 %v510_v11, 0.0 }
  0xbb   :  { %v567_v48 = vpack.c.bf16 %v539_v46, %v538_v43  ;;  %v2517_v43 = vld [vmem:[%s3516_s5 + $0x14] ss:$8 sps:$4 sm:$0xff]  }
  0xbc   :  { %v331_v49 = vpop.permute.xlu1 %330  ;;  %v168_v26 = vpop.permute.xlu0 %167  ;;  %1051 = vmatprep.subr.bf16.mxu1 %v2517_v43 }
  0xbd   :  { %v437_v51 = vmul.f32 %v2838_v37, %v331_v49  ;;  %414 = vperm.xlu1 %2483, %v2817_v33   ;;  %2244 = vmatmul.mubr.msk.bf16.gmra.mxu0 %vm628_vm0, %v567_v48  ;;  %v277_v31 = vmul.f32 %v2843_v38, %v168_v26 }
  0xbe   :  { %749 = vmatprep.mubr.bf16.mxu0 %v3527_v1  ;;  %1052 = vmatpush1.bf16.msra.mxu1 %v2519_v47 }
  0xbf   :  { %v469_v52 = vadd.f32 %v437_v51, %v272_v50  ;;  %v2520_v51 = vld [vmem:[%s3516_s5 + $0x4] ss:$8 sps:$4 sm:$0xff]  }
  0xc0   :  { %v335_v55 = vpop.permute.xlu1 %334  ;;  %v173_v34 = vpop.permute.xlu0 %172  ;;  %1053 = vmatprep.subr.bf16.mxu1 %v2520_v51 }
  0xc1   :  { %v438_v57 = vmul.f32 %v2838_v37, %v335_v55  ;;  %2484 = vset.pattern.permute.xlu1 %v3527_v1  ;;  %v508_v33 = vadd.f32 %v2853_v45, %v469_v52  ;;  %v278_v42 = vmul.f32 %v2843_v38, %v173_v34 }
  0xc2   :  { %257 = vperm.xlu1 %2484, %v98_v54  }
  0xc3   :  { %v470_v58 = vadd.f32 %v438_v57, %v273_v53  ;;  %v540_v3 = vmax.f32 %v508_v33, 0.0  ;;  %v475_v50 = vadd.f32 %v443_v40, %v278_v42  ;;  %v2522_v53 = vld [vmem:[%s3516_s5] ss:$8 sps:$4 sm:$0xff]  }
  0xc4   :  { %1054 = vmatpush1.bf16.msra.mxu1 %v2522_v53 }
  0xc5   :  { %v509_v62 = vadd.f32 %v2853_v45, %v470_v58  ;;  %v158_v63 = vpop.permute.xlu1 %157  ;;  %v514_v57 = vadd.f32 %v2853_v45, %v475_v50  ;;  %v188_v58 = vpop.permute.xlu0 %187 }
  0xc6   :  { %2486 = vset.pattern.permute.xlu1 %v2602_v0  ;;  %v275_v10 = vmul.f32 %v2843_v38, %v158_v63 }
  0xc7   :  { %v541_v4 = vmax.f32 %v509_v62, 0.0  ;;  %422 = vperm.xlu1 %2486, %v98_v54   ;;  %v546_v60 = vmax.f32 %v514_v57, 0.0 }
  0xc9   :  { %v568_v7 = vpack.c.bf16 %v541_v4, %v540_v3  ;;  %v193_v63 = vpop.permute.xlu0 %192 }
  0xca   :  { %v343_v9 = vpop.permute.xlu1 %342  ;;  %v282_v12 = vmul.f32 %v2843_v38, %v193_v63 }
  0xcb   :  { %v440_v0 = vmul.f32 %v2838_v37, %v343_v9  ;;  %2245 = vmatmul.mubr.msk.bf16.gmra.mxu0 %vm628_vm0, %v568_v7  ;;  %v281_v7 = vmul.f32 %v2843_v38, %v188_v58 }
  0xcc   :  { %759 = vmatprep.mubr.bf16.mxu0 %v3527_v1 }
  0xcd   :  { %v472_v13 = vadd.f32 %v440_v0, %v275_v10  ;;  %v371_v9 = vpop.permute.xlu0 %370 }
  0xcf   :  { %v511_v17 = vadd.f32 %v2853_v45, %v472_v13  ;;  %v163_v19 = vpop.permute.xlu1 %162  ;;  %v447_v13 = vmul.f32 %v2838_v37, %v371_v9 }
  0xd0   :  { %v276_v28 = vmul.f32 %v2843_v38, %v163_v19 }
  0xd1   :  { %v543_v22 = vmax.f32 %v511_v17, 0.0 }
  0xd3   :  { %v569_v23 = vpack.c.bf16 %v543_v22, %v542_v18  ;;  %v479_v18 = vadd.f32 %v447_v13, %v282_v12 }
  0xd4   :  { %v347_v25 = vpop.permute.xlu1 %346 }
  0xd5   :  { %v441_v29 = vmul.f32 %v2838_v37, %v347_v25  ;;  %2246 = vmatmul.mubr.msk.bf16.gmra.mxu0 %vm628_vm0, %v569_v23  ;;  %v518_v23 = vadd.f32 %v2853_v45, %v479_v18  ;;  %v387_v25 = vpop.permute.xlu0 %386 }
  0xd6   :  { %769 = vmatprep.mubr.bf16.mxu0 %v3527_v1 }
  0xd7   :  { %v473_v30 = vadd.f32 %v441_v29, %v276_v28  ;;  %v550_v27 = vmax.f32 %v518_v23, 0.0 }
  0xd8   :  { %v351_v32 = vpop.permute.xlu1 %350 }
  0xd9   :  { %v442_v35 = vmul.f32 %v2838_v37, %v351_v32  ;;  %v512_v39 = vadd.f32 %v2853_v45, %v473_v30  ;;  %v208_v32 = vpop.permute.xlu0 %207 }
  0xdb   :  { %v474_v41 = vadd.f32 %v442_v35, %v277_v31  ;;  %v544_v48 = vmax.f32 %v512_v39, 0.0  ;;  %v285_v39 = vmul.f32 %v2843_v38, %v208_v32 }
  0xdd   :  { %v513_v44 = vadd.f32 %v2853_v45, %v474_v41  ;;  %v178_v46 = vpop.permute.xlu1 %177  ;;  %v213_v41 = vpop.permute.xlu0 %212 }
  0xde   :  { %v279_v55 = vmul.f32 %v2843_v38, %v178_v46  ;;  %v286_v47 = vmul.f32 %v2843_v38, %v213_v41 }
  0xdf   :  { %v545_v49 = vmax.f32 %v513_v44, 0.0  ;;  %v451_v44 = vmul.f32 %v2838_v37, %v387_v25 }
  0xe1   :  { %v570_v52 = vpack.c.bf16 %v545_v49, %v544_v48 }
  0xe2   :  { %v359_v54 = vpop.permute.xlu1 %358 }
  0xe3   :  { %v444_v56 = vmul.f32 %v2838_v37, %v359_v54  ;;  %2247 = vmatmul.mubr.msk.bf16.gmra.mxu0 %vm628_vm0, %v570_v52  ;;  %v483_v52 = vadd.f32 %v451_v44, %v286_v47 }
  0xe4   :  { %779 = vmatprep.mubr.bf16.mxu0 %v3527_v1 }
  0xe5   :  { %v476_v33 = vadd.f32 %v444_v56, %v279_v55  ;;  %v522_v56 = vadd.f32 %v2853_v45, %v483_v52 }
  0xe7   :  { %v515_v59 = vadd.f32 %v2853_v45, %v476_v33  ;;  %v183_v61 = vpop.permute.xlu1 %182  ;;  %v554_v58 = vmax.f32 %v522_v56, 0.0 }
  0xe8   :  { %v280_v4 = vmul.f32 %v2843_v38, %v183_v61  ;;  %v228_v61 = vpop.permute.xlu0 %227 }
  0xe9   :  { %v547_v62 = vmax.f32 %v515_v59, 0.0 }
  0xeb   :  { %v571_v2 = vpack.c.bf16 %v547_v62, %v546_v60 }
  0xec   :  { %v363_v3 = vpop.permute.xlu1 %362 }
  0xed   :  { %v445_v5 = vmul.f32 %v2838_v37, %v363_v3  ;;  %2248 = vmatmul.mubr.msk.bf16.gmra.mxu0 %vm628_vm0, %v571_v2  ;;  %v403_v3 = vpop.permute.xlu0 %402 }
  0xee   :  { %789 = vmatprep.mubr.bf16.mxu0 %v3527_v1  ;;  %v455_v12 = vmul.f32 %v2838_v37, %v403_v3 }
  0xef   :  { %v477_v6 = vadd.f32 %v445_v5, %v280_v4 }
  0xf0   :  { %v367_v8 = vpop.permute.xlu1 %366 }
  0xf1   :  { %v446_v10 = vmul.f32 %v2838_v37, %v367_v8  ;;  %v516_v0 = vadd.f32 %v2853_v45, %v477_v6  ;;  %v289_v8 = vmul.f32 %v2843_v38, %v228_v61 }
  0xf3   :  { %v478_v11 = vadd.f32 %v446_v10, %v281_v7  ;;  %v548_v16 = vmax.f32 %v516_v0, 0.0  ;;  %v233_v10 = vpop.permute.xlu0 %232 }
  0xf4   :  { %v290_v13 = vmul.f32 %v2843_v38, %v233_v10 }
  0xf5   :  { %v517_v14 = vadd.f32 %v2853_v45, %v478_v11  ;;  %v198_v15 = vpop.permute.xlu1 %197 }
  0xf6   :  { %v283_v21 = vmul.f32 %v2843_v38, %v198_v15  ;;  %v487_v18 = vadd.f32 %v455_v12, %v290_v13 }
  0xf7   :  { %v549_v17 = vmax.f32 %v517_v14, 0.0  ;;  %v248_v25 = vpop.permute.xlu0 %247 }
  0xf9   :  { %v572_v19 = vpack.c.bf16 %v549_v17, %v548_v16 }
  0xfa   :  { %v375_v20 = vpop.permute.xlu1 %374 }
  0xfb   :  { %v448_v22 = vmul.f32 %v2838_v37, %v375_v20  ;;  %2249 = vmatmul.mubr.msk.bf16.gmra.mxu0 %vm628_vm0, %v572_v19 }
  0xfc   :  { %799 = vmatprep.mubr.bf16.mxu0 %v3527_v1 }
  0xfd   :  { %v480_v24 = vadd.f32 %v448_v22, %v283_v21  ;;  %v526_v22 = vadd.f32 %v2853_v45, %v487_v18 }
  0xff   :  { %v519_v26 = vadd.f32 %v2853_v45, %v480_v24  ;;  %v203_v28 = vpop.permute.xlu1 %202 }
 0x100   :  { %v284_v34 = vmul.f32 %v2843_v38, %v203_v28 }
 0x101   :  { %v551_v29 = vmax.f32 %v519_v26, 0.0  ;;  %v558_v26 = vmax.f32 %v526_v22, 0.0 }
 0x103   :  { %v573_v30 = vpack.c.bf16 %v551_v29, %v550_v27 }
 0x104   :  { %v379_v31 = vpop.permute.xlu1 %378 }
 0x105   :  { %v449_v35 = vmul.f32 %v2838_v37, %v379_v31  ;;  %2250 = vmatmul.mubr.msk.bf16.gmra.mxu0 %vm628_vm0, %v573_v30  ;;  %v253_v31 = vpop.permute.xlu0 %252 }
 0x106   :  { %809 = vmatprep.mubr.bf16.mxu0 %v3527_v1 }
 0x107   :  { %v481_v36 = vadd.f32 %v449_v35, %v284_v34 }
 0x108   :  { %v383_v40 = vpop.permute.xlu1 %382 }
 0x109   :  { %v450_v42 = vmul.f32 %v2838_v37, %v383_v40  ;;  %v520_v43 = vadd.f32 %v2853_v45, %v481_v36  ;;  %v293_v40 = vmul.f32 %v2843_v38, %v248_v25 }
 0x10b   :  { %v482_v46 = vadd.f32 %v450_v42, %v285_v39  ;;  %v552_v50 = vmax.f32 %v520_v43, 0.0  ;;  %v419_v42 = vpop.permute.xlu0 %418 }
 0x10c   :  { %v459_v47 = vmul.f32 %v2838_v37, %v419_v42 }
 0x10d   :  { %v521_v48 = vadd.f32 %v2853_v45, %v482_v46  ;;  %v218_v49 = vpop.permute.xlu1 %217  ;;  %v294_v46 = vmul.f32 %v2843_v38, %v253_v31 }
 0x10e   :  { %v287_v55 = vmul.f32 %v2843_v38, %v218_v49 }
 0x10f   :  { %v553_v51 = vmax.f32 %v521_v48, 0.0  ;;  %v491_v52 = vadd.f32 %v459_v47, %v294_v46 }
 0x111   :  { %v574_v53 = vpack.c.bf16 %v553_v51, %v552_v50 }
 0x112   :  { %v391_v54 = vpop.permute.xlu1 %390 }
 0x113   :  { %v452_v57 = vmul.f32 %v2838_v37, %v391_v54  ;;  %2251 = vmatmul.mubr.msk.bf16.gmra.mxu0 %vm628_vm0, %v574_v53 }
 0x114   :  { %819 = vmatprep.mubr.bf16.mxu0 %v3527_v1 }
 0x115   :  { %v484_v33 = vadd.f32 %v452_v57, %v287_v55  ;;  %v530_v57 = vadd.f32 %v2853_v45, %v491_v52 }
 0x117   :  { %v523_v59 = vadd.f32 %v2853_v45, %v484_v33  ;;  %v223_v60 = vpop.permute.xlu1 %222 }
 0x118   :  { %v288_v4 = vmul.f32 %v2843_v38, %v223_v60 }
 0x119   :  { %v555_v62 = vmax.f32 %v523_v59, 0.0  ;;  %v562_v59 = vmax.f32 %v530_v57, 0.0 }
 0x11b   :  { %v575_v63 = vpack.c.bf16 %v555_v62, %v554_v58  ;;  %v891_v62 = vlaneseq }
 0x11c   :  { %v395_v2 = vpop.permute.xlu1 %394 }
 0x11d   :  { %v453_v5 = vmul.f32 %v2838_v37, %v395_v2  ;;  %2252 = vmatmul.mubr.msk.bf16.gmra.mxu0 %vm628_vm0, %v575_v63  ;;  %v3055_v63 = vshrl.u32 %v891_v62, 7 }
 0x11e   :  { %829 = vmatprep.mubr.bf16.mxu0 %v3527_v1 }
 0x11f   :  { %v485_v6 = vadd.f32 %v453_v5, %v288_v4  ;;  %v3058_v3 = vsub.s32 0, %v3055_v63 }
 0x120   :  { %v399_v7 = vpop.permute.xlu1 %398 }
 0x121   :  { %v454_v9 = vmul.f32 %v2838_v37, %v399_v7  ;;  %v524_v0 = vadd.f32 %v2853_v45, %v485_v6 }
 0x123   :  { %v486_v11 = vadd.f32 %v454_v9, %v289_v8  ;;  %v556_v16 = vmax.f32 %v524_v0, 0.0 }
 0x125   :  { %v525_v14 = vadd.f32 %v2853_v45, %v486_v11  ;;  %v238_v15 = vpop.permute.xlu1 %237 }
 0x126   :  { %v291_v21 = vmul.f32 %v2843_v38, %v238_v15 }
 0x127   :  { %v557_v17 = vmax.f32 %v525_v14, 0.0 }
 0x129   :  { %v576_v19 = vpack.c.bf16 %v557_v17, %v556_v16 }
 0x12a   :  { %v407_v20 = vpop.permute.xlu1 %406 }
 0x12b   :  { %v456_v23 = vmul.f32 %v2838_v37, %v407_v20  ;;  %2253 = vmatmul.mubr.msk.bf16.gmra.mxu0 %vm628_vm0, %v576_v19 }
 0x12c   :  { %839 = vmatprep.mubr.bf16.mxu0 %v3527_v1 }
 0x12d   :  { %v488_v24 = vadd.f32 %v456_v23, %v291_v21 }
 0x12f   :  { %v527_v27 = vadd.f32 %v2853_v45, %v488_v24  ;;  %v243_v28 = vpop.permute.xlu1 %242 }
 0x130   :  { %v292_v34 = vmul.f32 %v2843_v38, %v243_v28 }
 0x131   :  { %v559_v29 = vmax.f32 %v527_v27, 0.0 }
 0x133   :  { %v577_v30 = vpack.c.bf16 %v559_v29, %v558_v26 }
 0x134   :  { %v411_v32 = vpop.permute.xlu1 %410 }
 0x135   :  { %v457_v35 = vmul.f32 %v2838_v37, %v411_v32  ;;  %2254 = vmatmul.mubr.msk.bf16.gmra.mxu0 %vm628_vm0, %v577_v30 }
 0x136   :  { %849 = vmatprep.mubr.bf16.mxu0 %v3527_v1 }
 0x137   :  { %v489_v36 = vadd.f32 %v457_v35, %v292_v34 }
 0x138   :  { %v415_v39 = vpop.permute.xlu1 %414 }
 0x139   :  { %v458_v41 = vmul.f32 %v2838_v37, %v415_v39  ;;  %v528_v43 = vadd.f32 %v2853_v45, %v489_v36 }
 0x13b   :  { %v490_v44 = vadd.f32 %v458_v41, %v293_v40  ;;  %v560_v50 = vmax.f32 %v528_v43, 0.0 }
 0x13d   :  { %v529_v48 = vadd.f32 %v2853_v45, %v490_v44  ;;  %v258_v49 = vpop.permute.xlu1 %257 }
 0x13e   :  { %v295_v55 = vmul.f32 %v2843_v38, %v258_v49  ;;  %v886_v38 = vld [vmem:[%s3515_s4] sm:$0x1] }
 0x13f   :  { %v561_v51 = vmax.f32 %v529_v48, 0.0 }
 0x141   :  { %v578_v53 = vpack.c.bf16 %v561_v51, %v560_v50 }
 0x142   :  { %v423_v54 = vpop.permute.xlu1 %422 }
 0x143   :  { %v460_v56 = vmul.f32 %v2838_v37, %v423_v54  ;;  %2255 = vmatmul.mubr.msk.bf16.gmra.mxu0 %vm628_vm0, %v578_v53  ;;  %v887_v37 = vpack.c.bf16 %v886_v38, %v886_v38 }
 0x144   :  { %859 = vmatprep.mubr.bf16.mxu0 %v3527_v1 }
 0x145   :  { %v492_v33 = vadd.f32 %v460_v56, %v295_v55  ;;  %v889_v2 = vpack.i.b16 %v887_v37, %v887_v37 }
 0x147   :  { %v531_v58 = vadd.f32 %v2853_v45, %v492_v33  ;;  %v3063_v45 = vrot.slane %v889_v2, %v3058_v3 }
 0x149   :  { %v563_v60 = vmax.f32 %v531_v58, 0.0 }
 0x14b   :  { %v579_v61 = vpack.c.bf16 %v563_v60, %v562_v59 }
 0x14d   :  { %2256 = vmatmul.mubr.msk.bf16.gmra.mxu0 %vm628_vm0, %v579_v61 }
 0x15b   :  { %v711_v4 = vpop.f32.mrf.mxu0 }
 0x15d   :  { %v3060_v5 = vpop.f32.mrf.mxu0 }
 0x15f   :  { %v715_v6 = vpop.f32.mrf.mxu0 }
 0x160   :  { %v870_v7 = vpack.c.bf16 %v715_v6, %v711_v4 }
 0x161   :  { %v3065_v8 = vpop.f32.mrf.mxu0 }
 0x162   :  { %v895_v9 = vadd.bf16 %v3063_v45, %v870_v7 }
 0x164   :  { %v911_v0 = vmax.bf16 %v3527_v1, %v895_v9 }
 0x165   :  { %v721_v11 = vpop.f32.mrf.mxu0 }
 0x166   :  { %1072 = vmatmul.mubr.bf16.vlgmr.msra.gmra.mxu1 %v911_v0 }
 0x167   :  { %v3071_v12 = vpop.f32.mrf.mxu0  ;;  %1081 = vmatprep.mubr.bf16.mxu1 %v3527_v1 }
 0x169   :  { %v725_v13 = vpop.f32.mrf.mxu0 }
 0x16a   :  { %v871_v14 = vpack.c.bf16 %v725_v13, %v721_v11 }
 0x16b   :  { %v3074_v15 = vpop.f32.mrf.mxu0 }
 0x16c   :  { %v896_v16 = vadd.bf16 %v3063_v45, %v871_v14 }
 0x16e   :  { %v912_v18 = vmax.bf16 %v3527_v1, %v896_v16 }
 0x170   :  { %1082 = vmatmul.mubr.bf16.gmra.mxu1 %v912_v18 }
 0x171   :  { %1091 = vmatprep.mubr.bf16.mxu1 %v3527_v1 }
 0x173   :  { %v731_v19 = vpop.f32.mrf.mxu0 }
 0x175   :  { %v3081_v20 = vpop.f32.mrf.mxu0 }
 0x177   :  { %v735_v21 = vpop.f32.mrf.mxu0 }
 0x178   :  { %v872_v22 = vpack.c.bf16 %v735_v21, %v731_v19 }
 0x179   :  { %v3083_v23 = vpop.f32.mrf.mxu0 }
 0x17a   :  { %v897_v24 = vadd.bf16 %v3063_v45, %v872_v22 }
 0x17c   :  { %v913_v26 = vmax.bf16 %v3527_v1, %v897_v24 }
 0x17d   :  { %v741_v27 = vpop.f32.mrf.mxu0 }
 0x17e   :  { %1092 = vmatmul.mubr.bf16.gmra.mxu1 %v913_v26 }
 0x17f   :  { %v3089_v28 = vpop.f32.mrf.mxu0  ;;  %1101 = vmatprep.mubr.bf16.mxu1 %v3527_v1 }
 0x181   :  { %v745_v29 = vpop.f32.mrf.mxu0 }
 0x182   :  { %v873_v30 = vpack.c.bf16 %v745_v29, %v741_v27 }
 0x183   :  { %v3092_v31 = vpop.f32.mrf.mxu0 }
 0x184   :  { %v898_v32 = vadd.bf16 %v3063_v45, %v873_v30 }
 0x186   :  { %v914_v35 = vmax.bf16 %v3527_v1, %v898_v32 }
 0x188   :  { %1102 = vmatmul.mubr.bf16.gmra.mxu1 %v914_v35 }
 0x189   :  { %1111 = vmatprep.mubr.bf16.mxu1 %v3527_v1 }
 0x18b   :  { %v751_v36 = vpop.f32.mrf.mxu0 }
 0x18d   :  { %v3099_v39 = vpop.f32.mrf.mxu0 }
 0x18f   :  { %v755_v40 = vpop.f32.mrf.mxu0 }
 0x190   :  { %v874_v41 = vpack.c.bf16 %v755_v40, %v751_v36 }
 0x191   :  { %v3101_v42 = vpop.f32.mrf.mxu0 }
 0x192   :  { %v899_v43 = vadd.bf16 %v3063_v45, %v874_v41 }
 0x194   :  { %v915_v46 = vmax.bf16 %v3527_v1, %v899_v43 }
 0x195   :  { %v761_v47 = vpop.f32.mrf.mxu0 }
 0x196   :  { %1112 = vmatmul.mubr.bf16.gmra.mxu1 %v915_v46 }
 0x197   :  { %v3107_v48 = vpop.f32.mrf.mxu0  ;;  %1121 = vmatprep.mubr.bf16.mxu1 %v3527_v1 }
 0x199   :  { %v765_v49 = vpop.f32.mrf.mxu0 }
 0x19a   :  { %v875_v50 = vpack.c.bf16 %v765_v49, %v761_v47 }
 0x19b   :  { %v3110_v51 = vpop.f32.mrf.mxu0 }
 0x19c   :  { %v900_v52 = vadd.bf16 %v3063_v45, %v875_v50 }
 0x19e   :  { %v916_v54 = vmax.bf16 %v3527_v1, %v900_v52 }
 0x1a0   :  { %1122 = vmatmul.mubr.bf16.gmra.mxu1 %v916_v54 }
 0x1a1   :  { %1131 = vmatprep.mubr.bf16.mxu1 %v3527_v1 }
 0x1a3   :  { %v771_v55 = vpop.f32.mrf.mxu0 }
 0x1a5   :  { %v3117_v56 = vpop.f32.mrf.mxu0 }
 0x1a7   :  { %v775_v57 = vpop.f32.mrf.mxu0 }
 0x1a8   :  { %v876_v33 = vpack.c.bf16 %v775_v57, %v771_v55 }
 0x1a9   :  { %v3119_v58 = vpop.f32.mrf.mxu0 }
 0x1aa   :  { %v901_v59 = vadd.bf16 %v3063_v45, %v876_v33 }
 0x1ac   :  { %v917_v61 = vmax.bf16 %v3527_v1, %v901_v59 }
 0x1ad   :  { %v781_v62 = vpop.f32.mrf.mxu0 }
 0x1ae   :  { %1132 = vmatmul.mubr.bf16.gmra.mxu1 %v917_v61 }
 0x1af   :  { %v3125_v38 = vpop.f32.mrf.mxu0  ;;  %1141 = vmatprep.mubr.bf16.mxu1 %v3527_v1 }
 0x1b1   :  { %v785_v37 = vpop.f32.mrf.mxu0 }
 0x1b2   :  { %v877_v2 = vpack.c.bf16 %v785_v37, %v781_v62 }
 0x1b3   :  { %v3128_v4 = vpop.f32.mrf.mxu0 }
 0x1b4   :  { %v902_v6 = vadd.bf16 %v3063_v45, %v877_v2 }
 0x1b6   :  { %v918_v9 = vmax.bf16 %v3527_v1, %v902_v6 }
 0x1b8   :  { %1142 = vmatmul.mubr.bf16.gmra.mxu1 %v918_v9 }
 0x1b9   :  { %1151 = vmatprep.mubr.bf16.mxu1 %v3527_v1 }
 0x1bb   :  { %v791_v0 = vpop.f32.mrf.mxu0 }
 0x1bd   :  { %v3135_v11 = vpop.f32.mrf.mxu0 }
 0x1bf   :  { %v795_v13 = vpop.f32.mrf.mxu0 }
 0x1c0   :  { %v878_v14 = vpack.c.bf16 %v795_v13, %v791_v0 }
 0x1c1   :  { %v3137_v16 = vpop.f32.mrf.mxu0 }
 0x1c2   :  { %v903_v18 = vadd.bf16 %v3063_v45, %v878_v14 }
 0x1c4   :  { %v919_v21 = vmax.bf16 %v3527_v1, %v903_v18 }
 0x1c5   :  { %v801_v22 = vpop.f32.mrf.mxu0 }
 0x1c6   :  { %1152 = vmatmul.mubr.bf16.gmra.mxu1 %v919_v21 }
 0x1c7   :  { %v3143_v24 = vpop.f32.mrf.mxu0  ;;  %1161 = vmatprep.mubr.bf16.mxu1 %v3527_v1 }
 0x1c9   :  { %v805_v26 = vpop.f32.mrf.mxu0 }
 0x1ca   :  { %v879_v27 = vpack.c.bf16 %v805_v26, %v801_v22 }
 0x1cb   :  { %v3146_v29 = vpop.f32.mrf.mxu0 }
 0x1cc   :  { %v904_v30 = vadd.bf16 %v3063_v45, %v879_v27 }
 0x1ce   :  { %v920_v35 = vmax.bf16 %v3527_v1, %v904_v30 }
 0x1d0   :  { %1162 = vmatmul.mubr.bf16.gmra.mxu1 %v920_v35 }
 0x1d1   :  { %1171 = vmatprep.mubr.bf16.mxu1 %v3527_v1 }
 0x1d3   :  { %v811_v36 = vpop.f32.mrf.mxu0 }
 0x1d5   :  { %v3153_v40 = vpop.f32.mrf.mxu0 }
 0x1d6   :  { %3539 = vst [vmem:[#allocation8_spill] sm:$0xff] %v3153_v40 }
 0x1d7   :  { %v815_v41 = vpop.f32.mrf.mxu0 }
 0x1d8   :  { %v880_v43 = vpack.c.bf16 %v815_v41, %v811_v36  ;;  %v2530_v36 = vld [vmem:[%s3518_s7 + $0x20] sm:$0xff]  }
 0x1d9   :  { %v3155_v46 = vpop.f32.mrf.mxu0 }
 0x1da   :  { %3540 = vst [vmem:[#allocation9_spill] sm:$0xff] %v3155_v46  ;;  %v905_v47 = vadd.bf16 %v3063_v45, %v880_v43 }
 0x1dc   :  { %v921_v50 = vmax.bf16 %v3527_v1, %v905_v47 }
 0x1dd   :  { %v821_v52 = vpop.f32.mrf.mxu0 }
 0x1de   :  { %1172 = vmatmul.mubr.bf16.gmra.mxu1 %v921_v50 }
 0x1df   :  { %v3161_v54 = vpop.f32.mrf.mxu0  ;;  %1181 = vmatprep.mubr.bf16.mxu1 %v3527_v1 }
 0x1e0   :  { %3541 = vst [vmem:[#allocation10_spill] sm:$0xff] %v3161_v54 }
 0x1e1   :  { %v825_v55 = vpop.f32.mrf.mxu0 }
 0x1e2   :  { %v881_v57 = vpack.c.bf16 %v825_v55, %v821_v52 }
 0x1e3   :  { %v3164_v33 = vpop.f32.mrf.mxu0 }
 0x1e4   :  { %3542 = vst [vmem:[#allocation11_spill] sm:$0xff] %v3164_v33  ;;  %v906_v59 = vadd.bf16 %v3063_v45, %v881_v57 }
 0x1e6   :  { %v922_v62 = vmax.bf16 %v3527_v1, %v906_v59  ;;  %v2529_v59 = vld [vmem:[%s3518_s7 + $0x60] sm:$0xff]  }
 0x1e8   :  { %1182 = vmatmul.mubr.bf16.gmra.mxu1 %v922_v62 }
 0x1e9   :  { %1191 = vmatprep.mubr.bf16.mxu1 %v3527_v1 }
 0x1eb   :  { %v831_v37 = vpop.f32.mrf.mxu0 }
 0x1ed   :  { %v3171_v2 = vpop.f32.mrf.mxu0 }
 0x1ee   :  { %3543 = vst [vmem:[#allocation12_spill] sm:$0xff] %v3171_v2 }
 0x1ef   :  { %v835_v6 = vpop.f32.mrf.mxu0 }
 0x1f0   :  { %v882_v9 = vpack.c.bf16 %v835_v6, %v831_v37 }
 0x1f1   :  { %v3173_v0 = vpop.f32.mrf.mxu0 }
 0x1f2   :  { %3544 = vst [vmem:[#allocation13_spill] sm:$0xff] %v3173_v0  ;;  %v907_v13 = vadd.bf16 %v3063_v45, %v882_v9  ;;  %v2523_v9 = vld [vmem:[%s3518_s7 + $0x78] sm:$0xff]  }
 0x1f3   :  { %2309 = vmatprep.subr.bf16.mxu0 %v2523_v9 }
 0x1f4   :  { %v923_v18 = vmax.bf16 %v3527_v1, %v907_v13  ;;  %v2524_v13 = vld [vmem:[%s3518_s7 + $0x38] sm:$0xff]  }
 0x1f5   :  { %v841_v21 = vpop.f32.mrf.mxu0  ;;  %2310 = vmatpush3.bf16.msra.mxu0 %v2524_v13 }
 0x1f6   :  { %1192 = vmatmul.mubr.bf16.gmra.mxu1 %v923_v18  ;;  %v2525_v18 = vld [vmem:[%s3518_s7 + $0x70] sm:$0xff]  }
 0x1f7   :  { %v3179_v22 = vpop.f32.mrf.mxu0  ;;  %1201 = vmatprep.mubr.bf16.mxu1 %v3527_v1  ;;  %2311 = vmatprep.subr.bf16.mxu0 %v2525_v18 }
 0x1f8   :  { %3545 = vst [vmem:[#allocation14_spill] sm:$0xff] %v3179_v22 }
 0x1f9   :  { %v845_v26 = vpop.f32.mrf.mxu0 }
 0x1fa   :  { %v883_v27 = vpack.c.bf16 %v845_v26, %v841_v21 }
 0x1fb   :  { %v3182_v30 = vpop.f32.mrf.mxu0 }
 0x1fc   :  { %3546 = vst [vmem:[#allocation15_spill] sm:$0xff] %v3182_v30  ;;  %v908_v35 = vadd.bf16 %v3063_v45, %v883_v27  ;;  %v2526_v27 = vld [vmem:[%s3518_s7 + $0x30] sm:$0xff]  }
 0x1fd   :  { %2312 = vmatpush3.bf16.msra.mxu0 %v2526_v27 }
 0x1fe   :  { %v924_v41 = vmax.bf16 %v3527_v1, %v908_v35 }
 0x200   :  { %1202 = vmatmul.mubr.bf16.gmra.mxu1 %v924_v41 }
 0x201   :  { %1211 = vmatprep.mubr.bf16.mxu1 %v3527_v1 }
 0x203   :  { %v851_v43 = vpop.f32.mrf.mxu0 }
 0x205   :  { %v3189_v47 = vpop.f32.mrf.mxu0 }
 0x206   :  { %3547 = vst [vmem:[#allocation16_spill] sm:$0xff] %v3189_v47 }
 0x207   :  { %v855_v50 = vpop.f32.mrf.mxu0 }
 0x208   :  { %v884_v52 = vpack.c.bf16 %v855_v50, %v851_v43  ;;  %v2527_v43 = vld [vmem:[%s3518_s7 + $0x68] sm:$0xff]  }
 0x209   :  { %v3191_v55 = vpop.f32.mrf.mxu0  ;;  %v2528_v50 = vld [vmem:[%s3518_s7 + $0x28] sm:$0xff]   ;;  %2313 = vmatprep.subr.bf16.mxu0 %v2527_v43 }
 0x20a   :  { %3548 = vst [vmem:[#allocation17_spill] sm:$0xff] %v3191_v55  ;;  %v909_v57 = vadd.bf16 %v3063_v45, %v884_v52  ;;  %2314 = vmatpush3.bf16.msra.mxu0 %v2528_v50  ;;  %v1264_v52 = vld [vmem:[%s3517_s6] sm:$0x3] }
 0x20b   :  { %2315 = vmatprep.subr.bf16.mxu0 %v2529_v59 }
 0x20c   :  { %v925_v62 = vmax.bf16 %v3527_v1, %v909_v57 }
 0x20d   :  { %v861_v37 = vpop.f32.mrf.mxu0 }
 0x20e   :  { %1212 = vmatmul.mubr.bf16.gmra.mxu1 %v925_v62  ;;  %v1269_v62 = vrot.slane %v1264_v52, %v3058_v3  ;;  %2316 = vmatpush3.bf16.msra.mxu0 %v2530_v36  ;;  %v2531_v36 = vld [vmem:[%s3518_s7 + $0x58] sm:$0xff]  }
 0x20f   :  { %v3197_v6 = vpop.f32.mrf.mxu0  ;;  %1221 = vmatprep.mubr.bf16.mxu1 %v3527_v1  ;;  %2317 = vmatprep.subr.bf16.mxu0 %v2531_v36 }
 0x210   :  { %3549 = vst [vmem:[#allocation18_spill] sm:$0xff] %v3197_v6 }
 0x211   :  { %v865_v21 = vpop.f32.mrf.mxu0 }
 0x212   :  { %v885_v26 = vpack.c.bf16 %v865_v21, %v861_v37  ;;  %v1276_v21 = vpack.c.bf16 %v1269_v62, %v1269_v62 }
 0x214   :  { %v910_v35 = vadd.bf16 %v3063_v45, %v885_v26  ;;  %v1272_v45 = vsub.s32 1, %v3055_v63 }
 0x216   :  { %v926_v41 = vmax.bf16 %v3527_v1, %v910_v35  ;;  %v1273_v9 = vrot.slane %v1264_v52, %v1272_v45 }
 0x218   :  { %1222 = vmatmul.mubr.bf16.gmra.mxu1 %v926_v41  ;;  %v1277_v35 = vpack.c.bf16 %v1273_v9, %v1273_v9  ;;  %v1279_v41 = vpack.i.b16 %v1276_v21, %v1276_v21 }
 0x21a   :  { %v1286_v50 = vpack.i.b16 %v1277_v35, %v1277_v35  ;;  %v3232_v52 = vrot.slane %v1279_v41, %v3058_v3 }
 0x226   :  { %v1073_v57 = vpop.f32.mrf.mxu1 }
 0x228   :  { %v1075_v37 = vpop.f32.mrf.mxu1 }
 0x22a   :  { %v1077_v13 = vpop.f32.mrf.mxu1 }
 0x22b   :  { %v1232_v18 = vpack.c.bf16 %v1077_v13, %v1073_v57  ;;  %v3235_v57 = vrot.slane %v1286_v50, %v3058_v3 }
 0x22c   :  { %v1079_v26 = vpop.f32.mrf.mxu1 }
 0x22d   :  { %v1233_v27 = vpack.c.bf16 %v1079_v26, %v1075_v37  ;;  %v1292_v9 = vadd.bf16 %v3232_v52, %v1232_v18 }
 0x22f   :  { %v1293_v26 = vadd.bf16 %v3235_v57, %v1233_v27 }
 0x230   :  { %v1083_v43 = vpop.f32.mrf.mxu1 }
 0x232   :  { %v1085_v14 = vpop.f32.mrf.mxu1 }
 0x234   :  { %v1087_v45 = vpop.f32.mrf.mxu1 }
 0x235   :  { %v1234_v62 = vpack.c.bf16 %v1087_v45, %v1083_v43  ;;  %v2532_v43 = vld [vmem:[%s3518_s7 + $0x18] sm:$0xff]  }
 0x236   :  { %v1089_v37 = vpop.f32.mrf.mxu1  ;;  %2318 = vmatpush3.bf16.msra.mxu0 %v2532_v43 }
 0x237   :  { %v1294_v13 = vadd.bf16 %v3232_v52, %v1234_v62  ;;  %v1235_v21 = vpack.c.bf16 %v1089_v37, %v1085_v14 }
 0x239   :  { %v1324_v35 = vmax.bf16 %v1294_v13, %v1292_v9  ;;  %v1295_v61 = vadd.bf16 %v3235_v57, %v1235_v21  ;;  %v2533_v21 = vld [vmem:[%s3518_s7 + $0x50] sm:$0xff]  }
 0x23a   :  { %2319 = vmatprep.subr.bf16.mxu0 %v2533_v21 }
 0x23b   :  { %v1341_v41 = vmax.bf16 %v1295_v61, %v1293_v26 }
 0x23e   :  { %v1093_v49 = vpop.f32.mrf.mxu1 }
 0x240   :  { %v1095_v59 = vpop.f32.mrf.mxu1 }
 0x242   :  { %v1097_v18 = vpop.f32.mrf.mxu1 }
 0x243   :  { %v1236_v50 = vpack.c.bf16 %v1097_v18, %v1093_v49  ;;  %v2534_v49 = vld [vmem:[%s3518_s7 + $0x10] sm:$0xff]  }
 0x244   :  { %v1099_v14 = vpop.f32.mrf.mxu1  ;;  %2320 = vmatpush3.bf16.msra.mxu0 %v2534_v49 }
 0x245   :  { %v1296_v27 = vadd.bf16 %v3232_v52, %v1236_v50  ;;  %v1237_v45 = vpack.c.bf16 %v1099_v14, %v1095_v59 }
 0x247   :  { %v1325_v62 = vmax.bf16 %v1324_v35, %v1296_v27  ;;  %v1297_v61 = vadd.bf16 %v3235_v57, %v1237_v45 }
 0x248   :  { %v1103_v37 = vpop.f32.mrf.mxu1 }
 0x249   :  { %v1342_v9 = vmax.bf16 %v1341_v41, %v1297_v61 }
 0x24a   :  { %v1105_v13 = vpop.f32.mrf.mxu1 }
 0x24c   :  { %v1107_v26 = vpop.f32.mrf.mxu1 }
 0x24d   :  { %v1238_v36 = vpack.c.bf16 %v1107_v26, %v1103_v37 }
 0x24e   :  { %v1109_v43 = vpop.f32.mrf.mxu1 }
 0x24f   :  { %v1298_v35 = vadd.bf16 %v3232_v52, %v1238_v36  ;;  %v1239_v59 = vpack.c.bf16 %v1109_v43, %v1105_v13 }
 0x251   :  { %v1326_v18 = vmax.bf16 %v1325_v62, %v1298_v35  ;;  %v1299_v41 = vadd.bf16 %v3235_v57, %v1239_v59 }
 0x253   :  { %v1343_v50 = vmax.bf16 %v1342_v9, %v1299_v41 }
 0x256   :  { %v1113_v14 = vpop.f32.mrf.mxu1 }
 0x258   :  { %v1115_v27 = vpop.f32.mrf.mxu1 }
 0x25a   :  { %v1117_v45 = vpop.f32.mrf.mxu1 }
 0x25b   :  { %v1240_v61 = vpack.c.bf16 %v1117_v45, %v1113_v14 }
 0x25c   :  { %v1119_v32 = vpop.f32.mrf.mxu1 }
 0x25d   :  { %v1300_v19 = vadd.bf16 %v3232_v52, %v1240_v61  ;;  %v1241_v7 = vpack.c.bf16 %v1119_v32, %v1115_v27  ;;  %v2537_v32 = vld [vmem:[%s3518_s7 + $0x40] sm:$0xff]  }
 0x25f   :  { %v1327_v60 = vmax.bf16 %v1326_v18, %v1300_v19  ;;  %v1301_v37 = vadd.bf16 %v3235_v57, %v1241_v7  ;;  %v2535_v19 = vld [vmem:[%s3518_s7 + $0x48] sm:$0xff]  }
 0x260   :  { %v1123_v21 = vpop.f32.mrf.mxu1  ;;  %v2536_v7 = vld [vmem:[%s3518_s7 + $0x8] sm:$0xff]   ;;  %2321 = vmatprep.subr.bf16.mxu0 %v2535_v19 }
 0x261   :  { %v1344_v49 = vmax.bf16 %v1343_v50, %v1301_v37  ;;  %2322 = vmatpush3.bf16.msra.mxu0 %v2536_v7 }
 0x262   :  { %v1125_v26 = vpop.f32.mrf.mxu1  ;;  %2323 = vmatprep.subr.bf16.mxu0 %v2537_v32  ;;  %v2541_v32 = vld [vmem:[%s3520_s9 + $0x28] sm:$0xff]  }
 0x264   :  { %v1127_v36 = vpop.f32.mrf.mxu1 }
 0x265   :  { %v1242_v13 = vpack.c.bf16 %v1127_v36, %v1123_v21 }
 0x266   :  { %v1129_v62 = vpop.f32.mrf.mxu1 }
 0x267   :  { %v1302_v43 = vadd.bf16 %v3232_v52, %v1242_v13  ;;  %v1243_v9 = vpack.c.bf16 %v1129_v62, %v1125_v26 }
 0x269   :  { %v1328_v35 = vmax.bf16 %v1327_v60, %v1302_v43  ;;  %v1303_v59 = vadd.bf16 %v3235_v57, %v1243_v9  ;;  %v2538_v60 = vld [vmem:[%s3518_s7] sm:$0xff]   ;;  %v2539_v9 = vld [vmem:[%s3520_s9 + $0x38] sm:$0xff]  }
 0x26a   :  { %2324 = vmatpush3.bf16.msra.mxu0 %v2538_v60  ;;  %2365 = vmatprep.subr.bf16.mxu1 %v2539_v9 }
 0x26b   :  { %v1345_v41 = vmax.bf16 %v1344_v49, %v1303_v59  ;;  %v2540_v59 = vld [vmem:[%s3520_s9 + $0x30] sm:$0xff]   ;;  %2366 = vmatpush3.bf16.msra.mxu1 %v2539_v9 }
 0x26c   :  { %2367 = vmatprep.subr.bf16.mxu1 %v2540_v59 }
 0x26e   :  { %v1133_v14 = vpop.f32.mrf.mxu1 }
 0x26f   :  { %2368 = vmatpush3.bf16.msra.mxu1 %v2540_v59 }
 0x270   :  { %v1135_v18 = vpop.f32.mrf.mxu1  ;;  %2369 = vmatprep.subr.bf16.mxu1 %v2541_v32 }
 0x272   :  { %v1137_v50 = vpop.f32.mrf.mxu1 }
 0x273   :  { %v1244_v27 = vpack.c.bf16 %v1137_v50, %v1133_v14  ;;  %v2542_v50 = vld [vmem:[%s3520_s9 + $0x20] sm:$0xff]   ;;  %2370 = vmatpush3.bf16.msra.mxu1 %v2541_v32 }
 0x274   :  { %v1139_v45 = vpop.f32.mrf.mxu1  ;;  %2371 = vmatprep.subr.bf16.mxu1 %v2542_v50 }
 0x275   :  { %v1304_v61 = vadd.bf16 %v3232_v52, %v1244_v27  ;;  %v1245_v37 = vpack.c.bf16 %v1139_v45, %v1135_v18  ;;  %v2543_v45 = vld [vmem:[%s3520_s9 + $0x18] sm:$0xff]  }
 0x277   :  { %v1329_v21 = vmax.bf16 %v1328_v35, %v1304_v61  ;;  %v1305_v49 = vadd.bf16 %v3235_v57, %v1245_v37  ;;  %2372 = vmatpush3.bf16.msra.mxu1 %v2542_v50  ;;  %v2544_v37 = vld [vmem:[%s3520_s9 + $0x10] sm:$0xff]  }
 0x278   :  { %v1143_v26 = vpop.f32.mrf.mxu1  ;;  %2373 = vmatprep.subr.bf16.mxu1 %v2543_v45 }
 0x279   :  { %v1346_v36 = vmax.bf16 %v1345_v41, %v1305_v49 }
 0x27a   :  { %v1145_v13 = vpop.f32.mrf.mxu1 }
 0x27b   :  { %2374 = vmatpush3.bf16.msra.mxu1 %v2543_v45 }
 0x27c   :  { %v1147_v62 = vpop.f32.mrf.mxu1  ;;  %2375 = vmatprep.subr.bf16.mxu1 %v2544_v37 }
 0x27d   :  { %v1246_v43 = vpack.c.bf16 %v1147_v62, %v1143_v26  ;;  %v2545_v26 = vld [vmem:[%s3520_s9 + $0x8] sm:$0xff]  }
 0x27e   :  { %v1149_v14 = vpop.f32.mrf.mxu1 }
 0x27f   :  { %v1306_v19 = vadd.bf16 %v3232_v52, %v1246_v43  ;;  %v1247_v7 = vpack.c.bf16 %v1149_v14, %v1145_v13  ;;  %2376 = vmatpush3.bf16.msra.mxu1 %v2544_v37 }
 0x280   :  { %2377 = vmatprep.subr.bf16.mxu1 %v2545_v26 }
 0x281   :  { %v3282_v35 = vmax.bf16 %v1329_v21, %v1306_v19  ;;  %v1307_v41 = vadd.bf16 %v3235_v57, %v1247_v7 }
 0x283   :  { %v3288_v18 = vmax.bf16 %v1346_v36, %v1307_v41  ;;  %2378 = vmatpush3.bf16.msra.mxu1 %v2545_v26  ;;  %v1331_v0 = vunpack.i.l.bf16 %v3282_v35  ;;  %v1332_v54 = vunpack.i.h.bf16 %v3282_v35 }
 0x285   :  { %v1348_v33 = vunpack.i.l.bf16 %v3288_v18  ;;  %v1349_v46 = vunpack.i.h.bf16 %v3288_v18 }
 0x286   :  { %v1153_v60 = vpop.f32.mrf.mxu1 }
 0x287   :  { %v1350_v18 = vmax.f32 %v1348_v33, %v1349_v46 }
 0x288   :  { %v1155_v27 = vpop.f32.mrf.mxu1 }
 0x28a   :  { %v1157_v61 = vpop.f32.mrf.mxu1 }
 0x28b   :  { %v1248_v10 = vpack.c.bf16 %v1157_v61, %v1153_v60 }
 0x28c   :  { %v1159_v21 = vpop.f32.mrf.mxu1 }
 0x28d   :  { %v1249_v55 = vpack.c.bf16 %v1159_v21, %v1155_v27 }
 0x290   :  { %v1163_v49 = vpop.f32.mrf.mxu1 }
 0x292   :  { %v1165_v36 = vpop.f32.mrf.mxu1 }
 0x294   :  { %v1167_v13 = vpop.f32.mrf.mxu1 }
 0x295   :  { %v1250_v37 = vpack.c.bf16 %v1167_v13, %v1163_v49  ;;  %v1308_v49 = vadd.bf16 %v3232_v52, %v1248_v10  ;;  %v1309_v13 = vadd.bf16 %v3235_v57, %v1249_v55 }
 0x296   :  { %v1169_v62 = vpop.f32.mrf.mxu1 }
 0x297   :  { %v1251_v26 = vpack.c.bf16 %v1169_v62, %v1165_v36  ;;  %v1310_v22 = vadd.bf16 %v3232_v52, %v1250_v37 }
 0x299   :  { %v1311_v60 = vadd.bf16 %v3235_v57, %v1251_v26  ;;  %v1358_v62 = vmax.bf16 %v1310_v22, %v1308_v49 }
 0x29e   :  { %v1173_v43 = vpop.f32.mrf.mxu1 }
 0x2a0   :  { %v1175_v9 = vpop.f32.mrf.mxu1 }
 0x2a2   :  { %v1177_v59 = vpop.f32.mrf.mxu1 }
 0x2a3   :  { %v1252_v6 = vpack.c.bf16 %v1177_v59, %v1173_v43 }
 0x2a4   :  { %v1179_v14 = vpop.f32.mrf.mxu1 }
 0x2a5   :  { %v1253_v30 = vpack.c.bf16 %v1179_v14, %v1175_v9  ;;  %v1312_v61 = vadd.bf16 %v3232_v52, %v1252_v6  ;;  %v1333_v14 = vmax.f32 %v1331_v0, %v1332_v54 }
 0x2a7   :  { %v1313_v43 = vadd.bf16 %v3235_v57, %v1253_v30  ;;  %v1359_v10 = vmax.bf16 %v1358_v62, %v1312_v61 }
 0x2a8   :  { %v1183_v19 = vpop.f32.mrf.mxu1 }
 0x2aa   :  { %v1185_v7 = vpop.f32.mrf.mxu1 }
 0x2ac   :  { %v1187_v41 = vpop.f32.mrf.mxu1 }
 0x2ad   :  { %v1254_v40 = vpack.c.bf16 %v1187_v41, %v1183_v19  ;;  %v1375_v19 = vmax.bf16 %v1311_v60, %v1309_v13 }
 0x2ae   :  { %v1189_v32 = vpop.f32.mrf.mxu1 }
 0x2af   :  { %v1255_v21 = vpack.c.bf16 %v1189_v32, %v1185_v7  ;;  %v1314_v35 = vadd.bf16 %v3232_v52, %v1254_v40  ;;  %v1376_v32 = vmax.bf16 %v1375_v19, %v1313_v43 }
 0x2b1   :  { %v1315_v37 = vadd.bf16 %v3235_v57, %v1255_v21  ;;  %v1360_v22 = vmax.bf16 %v1359_v10, %v1314_v35 }
 0x2b3   :  { %v1377_v54 = vmax.bf16 %v1376_v32, %v1315_v37 }
 0x2b6   :  { %v1193_v50 = vpop.f32.mrf.mxu1 }
 0x2b8   :  { %v1195_v45 = vpop.f32.mrf.mxu1 }
 0x2ba   :  { %v1197_v53 = vpop.f32.mrf.mxu1 }
 0x2bb   :  { %v1256_v36 = vpack.c.bf16 %v1197_v53, %v1193_v50 }
 0x2bc   :  { %v1199_v44 = vpop.f32.mrf.mxu1 }
 0x2bd   :  { %v1257_v9 = vpack.c.bf16 %v1199_v44, %v1195_v45  ;;  %v1316_v6 = vadd.bf16 %v3232_v52, %v1256_v36 }
 0x2bf   :  { %v1317_v30 = vadd.bf16 %v3235_v57, %v1257_v9  ;;  %v1361_v33 = vmax.bf16 %v1360_v22, %v1316_v6 }
 0x2c0   :  { %v1203_v34 = vpop.f32.mrf.mxu1 }
 0x2c2   :  { %v1205_v1 = vpop.f32.mrf.mxu1 }
 0x2c4   :  { %v1207_v25 = vpop.f32.mrf.mxu1 }
 0x2c5   :  { %v1258_v59 = vpack.c.bf16 %v1207_v25, %v1203_v34  ;;  %v1334_v25 = vrot.slane %v1333_v14, 4  ;;  %v1351_v34 = vrot.slane %v1350_v18, 4 }
 0x2c6   :  { %v1209_v17 = vpop.f32.mrf.mxu1 }
 0x2c7   :  { %v1259_v7 = vpack.c.bf16 %v1209_v17, %v1205_v1  ;;  %v1318_v40 = vadd.bf16 %v3232_v52, %v1258_v59  ;;  %v1378_v1 = vmax.bf16 %v1377_v54, %v1317_v30  ;;  %v1335_v49 = vmax.f32 %v1333_v14, %v1334_v25 }
 0x2c8   :  { %v1352_v60 = vmax.f32 %v1350_v18, %v1351_v34 }
 0x2c9   :  { %v1319_v0 = vadd.bf16 %v3235_v57, %v1259_v7  ;;  %v1362_v17 = vmax.bf16 %v1361_v33, %v1318_v40  ;;  %v1336_v35 = vrot.slane %v1335_v49, 2 }
 0x2ca   :  { %v1353_v9 = vrot.slane %v1352_v60, 2 }
 0x2cb   :  { %v1337_v14 = vmax.f32 %v1335_v49, %v1336_v35  ;;  %v3327_v35 = vpop.f32.mrf.mxu0 }
 0x2ce   :  { %v1213_v47 = vpop.f32.mrf.mxu1 }
 0x2d0   :  { %v1215_v2 = vpop.f32.mrf.mxu1 }
 0x2d2   :  { %v1217_v27 = vpop.f32.mrf.mxu1 }
 0x2d3   :  { %v1260_v53 = vpack.c.bf16 %v1217_v27, %v1213_v47  ;;  %v1379_v27 = vmax.bf16 %v1378_v1, %v1319_v0 }
 0x2d4   :  { %v1219_v41 = vpop.f32.mrf.mxu1 }
 0x2d5   :  { %v1261_v44 = vpack.c.bf16 %v1219_v41, %v1215_v2  ;;  %v1320_v50 = vadd.bf16 %v3232_v52, %v1260_v53  ;;  %v1354_v53 = vmax.f32 %v1352_v60, %v1353_v9 }
 0x2d7   :  { %v1321_v47 = vadd.bf16 %v3235_v57, %v1261_v44  ;;  %v1363_v2 = vmax.bf16 %v1362_v17, %v1320_v50  ;;  %v1355_v40 = vrot.slane %v1354_v53, 1 }
 0x2d8   :  { %v1223_v55 = vpop.f32.mrf.mxu1 }
 0x2d9   :  { %v1380_v13 = vmax.bf16 %v1379_v27, %v1321_v47 }
 0x2da   :  { %v1225_v46 = vpop.f32.mrf.mxu1 }
 0x2dc   :  { %v1227_v45 = vpop.f32.mrf.mxu1 }
 0x2dd   :  { %v1262_v26 = vpack.c.bf16 %v1227_v45, %v1223_v55 }
 0x2de   :  { %v1229_v61 = vpop.f32.mrf.mxu1 }
 0x2df   :  { %v1322_v21 = vadd.bf16 %v3232_v52, %v1262_v26  ;;  %v1263_v36 = vpack.c.bf16 %v1229_v61, %v1225_v46  ;;  %v1338_v52 = vrot.slane %v1337_v14, 1  ;;  %v1356_v46 = vmax.f32 %v1354_v53, %v1355_v40 }
 0x2e1   :  { %v1364_v62 = vmax.bf16 %v1363_v2, %v1322_v21  ;;  %v1323_v43 = vadd.bf16 %v3235_v57, %v1263_v36  ;;  %v1339_v25 = vmax.f32 %v1337_v14, %v1338_v52  ;;  %v1357_v45 = vpack.i.bf16 %v1356_v46, %v1356_v46 }
 0x2e2   :  { %v3552_v46 = vpack.c.bf16 %v3083_v23, %v3081_v20  ;;  %v3555_v23 = vpack.c.bf16 %v3101_v42, %v3099_v39  ;;  %v3557_v39 = vpack.c.bf16 %v3119_v58, %v3117_v56  ;;  %v3559_v56 = vpack.c.bf16 %v3137_v16, %v3135_v11 }
 0x2e3   :  { %v1365_v59 = vunpack.i.l.bf16 %v1364_v62  ;;  %v1366_v19 = vunpack.i.h.bf16 %v1364_v62  ;;  %v1381_v10 = vmax.bf16 %v1380_v13, %v1323_v43  ;;  %v1340_v50 = vpack.i.bf16 %v1339_v25, %v1339_v25  ;;  %v2546_v13 = vld [vmem:[%s3520_s9] sm:$0xff]  }
 0x2e4   :  { %v1429_v60 = vunpack.c.l.b16 %v1357_v45  ;;  %2379 = vmatprep.subr.bf16.mxu1 %v2546_v13  ;;  %v2604_v62 = vmov 1966171168   ;;  %v3551_v25 = vpack.c.bf16 %v3074_v15, %v3071_v12 }
 0x2e5   :  { %v1367_v41 = vmax.f32 %v1365_v59, %v1366_v19  ;;  %v1382_v37 = vunpack.i.l.bf16 %v1381_v10  ;;  %v1383_v6 = vunpack.i.h.bf16 %v1381_v10  ;;  %v1428_v49 = vunpack.c.l.b16 %v1340_v50  ;;  %2380 = vmatpush3.bf16.msra.mxu1 %v2546_v13 }
 0x2e6   :  { %v1578_v43 = vunpack.c.l.s4 %v2604_v62 }
 0x2e7   :  { %v1368_v18 = vrot.slane %v1367_v41, 4  ;;  %v1384_v7 = vmax.f32 %v1382_v37, %v1383_v6 }
 0x2e8   :  { %v1579_v9 = vunpack.c.0.s8 %v1578_v43 }
 0x2e9   :  { %v1369_v32 = vmax.f32 %v1367_v41, %v1368_v18  ;;  %v1385_v55 = vrot.slane %v1384_v7, 4  ;;  %v1633_v18 = vld [vmem:[%s3519_s8] sm:$0x1] }
 0x2ea   :  { %v1582_v41 = vsub.s32 %v1579_v9, %v3055_v63  ;;  %v3550_v63 = vpack.c.bf16 %v3065_v8, %v3060_v5  ;;  %v3554_v8 = vpack.c.bf16 %v3092_v31, %v3089_v28  ;;  %v3556_v28 = vpack.c.bf16 %v3110_v51, %v3107_v48 }
 0x2eb   :  { %v1370_v22 = vrot.slane %v1369_v32, 2  ;;  %v1386_v30 = vmax.f32 %v1384_v7, %v1385_v55  ;;  %v3558_v48 = vpack.c.bf16 %v3128_v4, %v3125_v38  ;;  %v3561_v4 = vld [vmem:[#allocation9_spill] sm:$0xff] }
 0x2ed   :  { %v1371_v44 = vmax.f32 %v1369_v32, %v1370_v22  ;;  %v1387_v57 = vrot.slane %v1386_v30, 2  ;;  %v1634_v32 = vpack.c.bf16 %v1633_v18, %v1633_v18 }
 0x2ef   :  { %v1372_v34 = vrot.slane %v1371_v44, 1  ;;  %v1388_v54 = vmax.f32 %v1386_v30, %v1387_v57  ;;  %v1636_v22 = vpack.i.b16 %v1634_v32, %v1634_v32 }
 0x2f1   :  { %v1373_v33 = vmax.f32 %v1371_v44, %v1372_v34  ;;  %v1389_v0 = vrot.slane %v1388_v54, 1  ;;  %v3336_v44 = vrot.slane %v1636_v22, %v3058_v3 }
 0x2f3   :  { %v1374_v1 = vpack.i.bf16 %v1373_v33, %v1373_v33  ;;  %v1390_v17 = vmax.f32 %v1388_v54, %v1389_v0 }
 0x2f5   :  { %v1391_v47 = vpack.i.bf16 %v1390_v17, %v1390_v17  ;;  %v1430_v26 = vunpack.c.l.b16 %v1374_v1  ;;  %v3553_v1 = vmov 0  }
 0x2f7   :  { %v1431_v61 = vunpack.c.l.b16 %v1391_v47  ;;  %v1433_v27 = vsel %vm1432_vm1, %v1430_v26, %v1428_v49 }
 0x2f8   :  { %v1435_v36 = vpack.c.b16 %v1433_v27, %v1433_v27 }
 0x2f9   :  { %v1434_v2 = vsel %vm1432_vm1, %v1431_v61, %v1429_v60 }
 0x2fa   :  { %v1436_v21 = vpack.c.b16 %v1434_v2, %v1434_v2 }
 0x2fc   :  { %1567 = vmatprep.mubr.bf16.mxu0 %v1436_v21 }
 0x2fd   :  { %1568 = vmatmul.mubr.bf16.vlgmr.msra.gmra.mxu0 %v1435_v36 }
 0x3bd   :  { %v2325_v59 = vpop.f32.mrf.mxu0 }
 0x3bf   :  { %v2326_v19 = vpop.f32.mrf.mxu0 }
 0x3c0   :  { %v2327_v10 = vadd.f32 %v2326_v19, %v2325_v59 }
 0x3c1   :  { %v2328_v37 = vpop.f32.mrf.mxu0 }
 0x3c2   :  { %v1575_v6 = vpack.c.bf16 %v2327_v10, %v2327_v10  ;;  %v3560_v10 = vpack.c.bf16 %v3146_v29, %v3143_v24  ;;  %v3562_v37 = vld [vmem:[#allocation8_spill] sm:$0xff]  ;;  %v3567_v29 = vld [vmem:[#allocation13_spill] sm:$0xff] }
 0x3c3   :  { %v2329_v14 = vpop.f32.mrf.mxu0 }
 0x3c4   :  { %v1583_v7 = vrot.slane %v1575_v6, %v1582_v41  ;;  %v3563_v6 = vpack.c.bf16 %v3561_v4, %v3562_v37 }
 0x3c6   :  { %v1590_v53 = vrot.slane %v1583_v7, %v1582_v41  ;;  %v3564_v7 = vld [vmem:[#allocation11_spill] sm:$0xff] }
 0x3c8   :  { %v2289_v55 = vpack.i.b16 %v1590_v53, %v1590_v53  ;;  %v1592_v33 = vunpack.i.h.s16 %v1590_v53  ;;  %v3565_v53 = vld [vmem:[#allocation10_spill] sm:$0xff] }
 0x3c9   :  { %v3566_v32 = vpack.c.bf16 %v3564_v7, %v3565_v53 }
 0x3ca   :  { %v1598_v52 = vrot.slane %v2289_v55, %v3058_v3  ;;  %v1594_v15 = vpack.i.b16 %v1592_v33, %v1592_v33 }
 0x3cc   :  { %v1604_v30 = vpack.i.b16 %v1598_v52, %v1598_v52  ;;  %v1602_v49 = vrot.slane %v1594_v15, %v3058_v3  ;;  %v3568_v52 = vld [vmem:[#allocation12_spill] sm:$0xff] }
 0x3cd   :  { %v3569_v22 = vpack.c.bf16 %v3567_v29, %v3568_v52 }
 0x3ce   :  { %v1609_v40 = vrot.slane %v1604_v30, %v3058_v3  ;;  %v1611_v27 = vpack.i.b16 %v1602_v49, %v1602_v49 }
 0x3d0   :  { %v1617_v57 = vadd.bf16 %v1609_v40, %v3550_v63  ;;  %v1618_v34 = vadd.bf16 %v1609_v40, %v3551_v25  ;;  %v1619_v54 = vadd.bf16 %v1609_v40, %v3552_v46  ;;  %v1620_v12 = vadd.bf16 %v1609_v40, %v3554_v8  ;;  %v3570_v25 = vld [vmem:[#allocation15_spill] sm:$0xff] }
 0x3d1   :  { %v1621_v47 = vadd.bf16 %v1609_v40, %v3555_v23  ;;  %v1622_v31 = vadd.bf16 %v1609_v40, %v3556_v28  ;;  %v1623_v42 = vadd.bf16 %v1609_v40, %v3557_v39  ;;  %v1616_v36 = vrot.slane %v1611_v27, %v3058_v3  ;;  %v2550_v28 = vld [vmem:[%s3522_s11] sm:$0xff]  }
 0x3d2   :  { %v1642_v0 = vadd.bf16 %v3336_v44, %v1617_v57  ;;  %v1643_v50 = vadd.bf16 %v3336_v44, %v1618_v34  ;;  %v1644_v45 = vadd.bf16 %v3336_v44, %v1619_v54  ;;  %v1645_v26 = vadd.bf16 %v3336_v44, %v1620_v12  ;;  %v3571_v34 = vld [vmem:[#allocation14_spill] sm:$0xff] }
 0x3d3   :  { %v1646_v60 = vadd.bf16 %v3336_v44, %v1621_v47  ;;  %v1647_v21 = vadd.bf16 %v3336_v44, %v1622_v31  ;;  %v1648_v13 = vadd.bf16 %v3336_v44, %v1623_v42  ;;  %v1624_v51 = vadd.bf16 %v1609_v40, %v3558_v48  ;;  %v3576_v12 = vld [vmem:[#allocation18_spill] sm:$0xff] }
 0x3d4   :  { %v1658_v17 = vmax.bf16 %v3553_v1, %v1642_v0  ;;  %v1659_v5 = vmax.bf16 %v3553_v1, %v1643_v50  ;;  %v1660_v20 = vmax.bf16 %v3553_v1, %v1644_v45  ;;  %v1661_v61 = vmax.bf16 %v3553_v1, %v1645_v26  ;;  %v3573_v0 = vld [vmem:[#allocation17_spill] sm:$0xff]  ;;  %v3574_v50 = vld [vmem:[#allocation16_spill] sm:$0xff] }
 0x3d5   :  { %v1662_v2 = vmax.bf16 %v3553_v1, %v1646_v60  ;;  %v1663_v62 = vmax.bf16 %v3553_v1, %v1647_v21  ;;  %v1664_v43 = vmax.bf16 %v3553_v1, %v1648_v13  ;;  %v1625_v58 = vadd.bf16 %v1616_v36, %v3559_v56  ;;  %v2547_v60 = vld [vmem:[%s3522_s11 + $0x18] sm:$0xff]  }
 0x3d6   :  { %2381 = vmatprep.mubr.bf16.mxu1 %v1658_v17  ;;  %v1649_v9 = vadd.bf16 %v3336_v44, %v1624_v51  ;;  %v1626_v41 = vadd.bf16 %v1616_v36, %v3560_v10  ;;  %v1627_v14 = vadd.bf16 %v1616_v36, %v3563_v6  ;;  %v1628_v55 = vadd.bf16 %v1616_v36, %v3566_v32  ;;  %v1915_v51 = vld [vmem:[%s3521_s10] sm:$0x1] }
 0x3d7   :  { %2382 = vmatmul.mubr.bf16.vlgmr.msra.gmra.mxu1 %v1659_v5  ;;  %v1650_v59 = vadd.bf16 %v3336_v44, %v1625_v58  ;;  %v1629_v30 = vadd.bf16 %v1616_v36, %v3569_v22  ;;  %v3572_v46 = vpack.c.bf16 %v3570_v25, %v3571_v34  ;;  %v3575_v45 = vpack.c.bf16 %v3573_v0, %v3574_v50 }
 0x3d8   :  { %2385 = vmatprep.mubr.bf16.mxu1 %v1660_v20  ;;  %v1665_v19 = vmax.bf16 %v3553_v1, %v1649_v9  ;;  %v1651_v11 = vadd.bf16 %v3336_v44, %v1626_v41  ;;  %v1652_v16 = vadd.bf16 %v3336_v44, %v1627_v14  ;;  %v1653_v40 = vadd.bf16 %v3336_v44, %v1628_v55 }
 0x3d9   :  { %v1666_v38 = vmax.bf16 %v3553_v1, %v1650_v59  ;;  %v1654_v63 = vadd.bf16 %v3336_v44, %v1629_v30  ;;  %v1630_v54 = vadd.bf16 %v1616_v36, %v3572_v46  ;;  %v1631_v17 = vadd.bf16 %v1616_v36, %v3575_v45 }
 0x3da   :  { %v1667_v18 = vmax.bf16 %v3553_v1, %v1651_v11  ;;  %v1668_v24 = vmax.bf16 %v3553_v1, %v1652_v16  ;;  %v1669_v57 = vmax.bf16 %v3553_v1, %v1653_v40  ;;  %v942_v15 = vpack.c.bf16 %v3327_v35, %v3576_v12  ;;  %v2548_v35 = vld [vmem:[%s3522_s11 + $0x10] sm:$0xff]  }
 0x3db   :  { %v1670_v33 = vmax.bf16 %v3553_v1, %v1654_v63  ;;  %v1655_v5 = vadd.bf16 %v3336_v44, %v1630_v54  ;;  %v1656_v8 = vadd.bf16 %v3336_v44, %v1631_v17  ;;  %v1916_v58 = vpack.c.bf16 %v1915_v51, %v1915_v51 }
 0x3dc   :  { %v1632_v23 = vadd.bf16 %v1616_v36, %v942_v15 }
 0x3dd   :  { %v1671_v20 = vmax.bf16 %v3553_v1, %v1655_v5  ;;  %v1672_v47 = vmax.bf16 %v3553_v1, %v1656_v8 }
 0x3de   :  { %v1657_v26 = vadd.bf16 %v3336_v44, %v1632_v23  ;;  %v2549_v44 = vld [vmem:[%s3522_s11 + $0x8] sm:$0xff]  }
 0x3df   :  { %2386 = vmatmul.mubr.bf16.gmra.mxu1 %v1661_v61  ;;  %v2605_v61 = vmov 0.0  }
 0x3e0   :  { %2389 = vmatprep.mubr.bf16.mxu1 %v1662_v2  ;;  %v1673_v49 = vmax.bf16 %v3553_v1, %v1657_v26  ;;  %2413 = vmatprep.subr.bf16.mxu0 %v2605_v61 }
 0x3e1   :  { %2421 = vmatprep.mubr.msk.bf16.mxu0 %vm2606_vm2, %v2605_v61  ;;  %2414 = vmatpush3.bf16.msra.mxu0 %v2547_v60 }
 0x3e2   :  { %2415 = vmatprep.subr.bf16.mxu0 %v2605_v61 }
 0x3e5   :  { %2416 = vmatpush3.bf16.msra.mxu0 %v2548_v35 }
 0x3e6   :  { %2417 = vmatprep.subr.bf16.mxu0 %v2605_v61 }
 0x3e7   :  { %2390 = vmatmul.mubr.bf16.gmra.mxu1 %v1663_v62 }
 0x3e8   :  { %2393 = vmatprep.mubr.bf16.mxu1 %v1664_v43 }
 0x3e9   :  { %2418 = vmatpush3.bf16.msra.mxu0 %v2549_v44 }
 0x3ea   :  { %2419 = vmatprep.subr.bf16.mxu0 %v2605_v61 }
 0x3ed   :  { %2420 = vmatpush3.bf16.msra.mxu0 %v2550_v28 }
 0x3ee   :  { %2425 = vmatprep.subr.bf16.mxu0 %v2605_v61 }
 0x3ef   :  { %2394 = vmatmul.mubr.bf16.gmra.mxu1 %v1665_v19  ;;  %v1918_v19 = vpack.i.b16 %v1916_v58, %v1916_v58 }
 0x3f0   :  { %2397 = vmatprep.mubr.bf16.mxu1 %v1666_v38 }
 0x3f1   :  { %v3442_v4 = vrot.slane %v1918_v19, %v3058_v3 }
 0x3f7   :  { %2398 = vmatmul.mubr.bf16.gmra.mxu1 %v1667_v18 }
 0x3f8   :  { %2401 = vmatprep.mubr.bf16.mxu1 %v1668_v24 }
 0x3ff   :  { %2402 = vmatmul.mubr.bf16.gmra.mxu1 %v1669_v57 }
 0x400   :  { %2405 = vmatprep.mubr.bf16.mxu1 %v1670_v33 }
 0x407   :  { %2406 = vmatmul.mubr.bf16.gmra.mxu1 %v1671_v20 }
 0x408   :  { %2409 = vmatprep.mubr.bf16.mxu1 %v1672_v47 }
 0x40f   :  { %2410 = vmatmul.mubr.bf16.gmra.mxu1 %v1673_v49 }
 0x497   :  { %v2383_v31 = vpop.f32.mrf.mxu1 }
 0x499   :  { %v1772_v27 = vpop.f32.mrf.mxu1 }
 0x49b   :  { %v2384_v2 = vpop.f32.mrf.mxu1 }
 0x49c   :  { %v1900_v16 = vpack.c.bf16 %v2384_v2, %v2383_v31 }
 0x49d   :  { %v1775_v39 = vpop.f32.mrf.mxu1 }
 0x49e   :  { %v1899_v37 = vpack.c.bf16 %v1775_v39, %v1772_v27  ;;  %v1925_v30 = vadd.bf16 %v3442_v4, %v1900_v16 }
 0x49f   :  { %v2387_v42 = vpop.f32.mrf.mxu1 }
 0x4a0   :  { %v1924_v55 = vadd.bf16 %v3442_v4, %v1899_v37  ;;  %v1941_v50 = vmax.bf16 %v3553_v1, %v1925_v30 }
 0x4a1   :  { %v1788_v21 = vpop.f32.mrf.mxu1 }
 0x4a2   :  { %v1940_v34 = vmax.bf16 %v3553_v1, %v1924_v55  ;;  %v1961_v49 = vsel %vm628_vm0, %v1941_v50, 4286644096 }
 0x4a3   :  { %v2388_v36 = vpop.f32.mrf.mxu1 }
 0x4a4   :  { %v1902_v6 = vpack.c.bf16 %v2388_v36, %v2387_v42  ;;  %v1958_v12 = vsel %vm628_vm0, %v1940_v34, 4286644096 }
 0x4a5   :  { %v1791_v13 = vpop.f32.mrf.mxu1 }
 0x4a6   :  { %v1901_v41 = vpack.c.bf16 %v1791_v13, %v1788_v21  ;;  %v1927_v24 = vadd.bf16 %v3442_v4, %v1902_v6 }
 0x4a7   :  { %v2391_v62 = vpop.f32.mrf.mxu1 }
 0x4a8   :  { %v1926_v18 = vadd.bf16 %v3442_v4, %v1901_v41  ;;  %v1943_v46 = vmax.bf16 %v3553_v1, %v1927_v24 }
 0x4a9   :  { %v1804_v48 = vpop.f32.mrf.mxu1 }
 0x4aa   :  { %v1942_v40 = vmax.bf16 %v3553_v1, %v1926_v18  ;;  %v1968_v15 = vsel %vm628_vm0, %v1943_v46, 4286644096 }
 0x4ab   :  { %v2392_v43 = vpop.f32.mrf.mxu1  ;;  %v1970_v44 = vmax.bf16 %v1968_v15, %v1961_v49 }
 0x4ac   :  { %v1904_v7 = vpack.c.bf16 %v2392_v43, %v2391_v62  ;;  %v1964_v45 = vsel %vm628_vm0, %v1942_v40, 4286644096 }
 0x4ad   :  { %v1807_v56 = vpop.f32.mrf.mxu1  ;;  %v1966_v47 = vmax.bf16 %v1964_v45, %v1958_v12 }
 0x4ae   :  { %v1903_v14 = vpack.c.bf16 %v1807_v56, %v1804_v48  ;;  %v1929_v63 = vadd.bf16 %v3442_v4, %v1904_v7 }
 0x4af   :  { %v2395_v9 = vpop.f32.mrf.mxu1 }
 0x4b0   :  { %v1928_v29 = vadd.bf16 %v3442_v4, %v1903_v14  ;;  %v1945_v17 = vmax.bf16 %v3553_v1, %v1929_v63 }
 0x4b1   :  { %v1820_v59 = vpop.f32.mrf.mxu1 }
 0x4b2   :  { %v1944_v54 = vmax.bf16 %v3553_v1, %v1928_v29  ;;  %v1976_v60 = vsel %vm628_vm0, %v1945_v17, 4286644096 }
 0x4b3   :  { %v2396_v10 = vpop.f32.mrf.mxu1  ;;  %v1978_v2 = vmax.bf16 %v1976_v60, %v1970_v44 }
 0x4b4   :  { %v1906_v52 = vpack.c.bf16 %v2396_v10, %v2395_v9  ;;  %v1972_v20 = vsel %vm628_vm0, %v1944_v54, 4286644096 }
 0x4b5   :  { %v1823_v38 = vpop.f32.mrf.mxu1  ;;  %v1974_v28 = vmax.bf16 %v1972_v20, %v1966_v47 }
 0x4b6   :  { %v1905_v53 = vpack.c.bf16 %v1823_v38, %v1820_v59  ;;  %v1931_v33 = vadd.bf16 %v3442_v4, %v1906_v52 }
 0x4b7   :  { %v2399_v11 = vpop.f32.mrf.mxu1 }
 0x4b8   :  { %v1930_v57 = vadd.bf16 %v3442_v4, %v1905_v53  ;;  %v1947_v23 = vmax.bf16 %v3553_v1, %v1931_v33 }
 0x4b9   :  { %v1836_v32 = vpop.f32.mrf.mxu1 }
 0x4ba   :  { %v1946_v5 = vmax.bf16 %v3553_v1, %v1930_v57  ;;  %v1984_v27 = vsel %vm628_vm0, %v1947_v23, 4286644096 }
 0x4bb   :  { %v2400_v22 = vpop.f32.mrf.mxu1  ;;  %v1986_v21 = vmax.bf16 %v1984_v27, %v1978_v2 }
 0x4bc   :  { %v1980_v35 = vsel %vm628_vm0, %v1946_v5, 4286644096  ;;  %v1908_v51 = vpack.c.bf16 %v2400_v22, %v2399_v11 }
 0x4bd   :  { %v1839_v25 = vpop.f32.mrf.mxu1  ;;  %v1982_v39 = vmax.bf16 %v1980_v35, %v1974_v28 }
 0x4be   :  { %v1907_v43 = vpack.c.bf16 %v1839_v25, %v1836_v32  ;;  %v1933_v37 = vadd.bf16 %v3442_v4, %v1908_v51 }
 0x4bf   :  { %v2403_v0 = vpop.f32.mrf.mxu1  ;;  %v1987_v48 = vmax.bf16 %v1986_v21, %v1982_v39 }
 0x4c0   :  { %v1932_v6 = vadd.bf16 %v3442_v4, %v1907_v43  ;;  %v1949_v55 = vmax.bf16 %v3553_v1, %v1933_v37  ;;  %v2121_v37 = vld [vmem:[%s3523_s12] sm:$0x1]  ;;  %s2221_s12 = sshll.u32 %s2607_s29, 4  ;;  %s2222_s12 = int_to_ptr.vmem [resolvable:$true] %s2221_s12 }
 0x4c1   :  { %v1852_v8 = vpop.f32.mrf.mxu1  ;;  %v1988_v41 = vunpack.i.l.bf16 %v1987_v48  ;;  %v1989_v38 = vunpack.i.h.bf16 %v1987_v48  ;;  %s2575_s30 = scalar_lea.vmem %s2222_s12, 32  ;;  %p2580_p6 = scmp.lt.s32.totalorder %s2222_s12, %s2222_s12 }
 0x4c2   :  { %v1948_v24 = vmax.bf16 %v3553_v1, %v1932_v6  ;;  %v2002_v54 = vsel %vm628_vm0, %v1949_v55, 4286644096  ;;  %v2122_v6 = vpack.c.bf16 %v2121_v37, %v2121_v37  ;;  %p2576_p5 = scmp.ne.s32.totalorder %s2222_s12, %s2575_s30  ;;  %p2581_p7 = scmp.lt.s32.totalorder %s2575_s30, %s2575_s30 }
 0x4c3   :  { %v2404_v26 = vpop.f32.mrf.mxu1  ;;  %v1990_v32 = vmax.f32 %v1988_v41, %v1989_v38  ;;  %v2553_v41 = vld [vmem:[#allocation2 + $0x8] sm:$0xff]   ;;  %v2554_v38 = vld [vmem:[#allocation2] sm:$0xff]  }
 0x4c4   :  { %v1910_v13 = vpack.c.bf16 %v2404_v26, %v2403_v0  ;;  %v1999_v33 = vsel %vm628_vm0, %v1948_v24, 4286644096  ;;  %p2582_p8 = por %p2581_p7, %p2580_p6 }
 0x4c5   :  { %v1855_v31 = vpop.f32.mrf.mxu1  ;;  %v1991_v46 = vrot.slane %v1990_v32, 4 }
 0x4c6   :  { %v1909_v62 = vpack.c.bf16 %v1855_v31, %v1852_v8  ;;  %v1935_v59 = vadd.bf16 %v3442_v4, %v1910_v13  ;;  %p2583_p9 = pnand %p2582_p8, %p2576_p5 }
 0x4c7   :  { %v2407_v42 = vpop.f32.mrf.mxu1  ;;  %v1992_v20 = vmax.f32 %v1990_v32, %v1991_v46 }
 0x4c8   :  { %v1934_v19 = vadd.bf16 %v3442_v4, %v1909_v62  ;;  %v1951_v7 = vmax.bf16 %v3553_v1, %v1935_v59  ;;  %v2551_v59 = vld [vmem:[#allocation2 + $0x18] sm:$0xff]  }
 0x4c9   :  { %v1868_v36 = vpop.f32.mrf.mxu1  ;;  %v1993_v35 = vrot.slane %v1992_v20, 2 }
 0x4ca   :  { %v1950_v53 = vmax.bf16 %v3553_v1, %v1934_v19  ;;  %v2009_v63 = vsel %vm628_vm0, %v1951_v7, 4286644096 }
 0x4cb   :  { %v2408_v56 = vpop.f32.mrf.mxu1  ;;  %v2011_v5 = vmax.bf16 %v2009_v63, %v2002_v54  ;;  %v1994_v27 = vmax.f32 %v1992_v20, %v1993_v35 }
 0x4cc   :  { %v1912_v58 = vpack.c.bf16 %v2408_v56, %v2407_v42  ;;  %v2005_v57 = vsel %vm628_vm0, %v1950_v53, 4286644096 }
 0x4cd   :  { %v1871_v9 = vpop.f32.mrf.mxu1  ;;  %v2007_v8 = vmax.bf16 %v2005_v57, %v1999_v33  ;;  %v1995_v39 = vrot.slane %v1994_v27, 1 }
 0x4ce   :  { %v1911_v10 = vpack.c.bf16 %v1871_v9, %v1868_v36  ;;  %v1937_v16 = vadd.bf16 %v3442_v4, %v1912_v58 }
 0x4cf   :  { %v2411_v14 = vpop.f32.mrf.mxu1  ;;  %v1996_v13 = vmax.f32 %v1994_v27, %v1995_v39 }
 0x4d0   :  { %v1936_v11 = vadd.bf16 %v3442_v4, %v1911_v10  ;;  %v1953_v52 = vmax.bf16 %v3553_v1, %v1937_v16  ;;  %v2552_v10 = vld [vmem:[#allocation2 + $0x10] sm:$0xff]  }
 0x4d1   :  { %v1884_v18 = vpop.f32.mrf.mxu1  ;;  %v1997_v48 = vpack.i.bf16 %v1996_v13, %v1996_v13 }
 0x4d2   :  { %v1952_v22 = vmax.bf16 %v3553_v1, %v1936_v11  ;;  %v2017_v0 = vsel %vm628_vm0, %v1953_v52, 4286644096 }
 0x4d3   :  { %v2412_v29 = vpop.f32.mrf.mxu1  ;;  %v2019_v23 = vmax.bf16 %v2017_v0, %v2011_v5  ;;  %v2049_v56 = vunpack.c.l.b16 %v1997_v48 }
 0x4d4   :  { %v1914_v30 = vpack.c.bf16 %v2412_v29, %v2411_v14  ;;  %v2013_v50 = vsel %vm628_vm0, %v1952_v22, 4286644096  ;;  %v2124_v14 = vpack.i.b16 %v2122_v6, %v2122_v6 }
 0x4d5   :  { %v1887_v40 = vpop.f32.mrf.mxu1  ;;  %v2015_v47 = vmax.bf16 %v2013_v50, %v2007_v8 }
 0x4d6   :  { %v1939_v25 = vadd.bf16 %v3442_v4, %v1914_v30  ;;  %v1913_v34 = vpack.c.bf16 %v1887_v40, %v1884_v18  ;;  %v2129_v16 = vrot.slane %v2124_v14, %v3058_v3 }
 0x4d8   :  { %v1955_v45 = vmax.bf16 %v3553_v1, %v1939_v25  ;;  %v1938_v17 = vadd.bf16 %v3442_v4, %v1913_v34 }
 0x4da   :  { %v2025_v12 = vsel %vm628_vm0, %v1955_v45, 4286644096  ;;  %v1954_v15 = vmax.bf16 %v3553_v1, %v1938_v17 }
 0x4db   :  { %v2027_v49 = vmax.bf16 %v2025_v12, %v2019_v23 }
 0x4dc   :  { %v2021_v26 = vsel %vm628_vm0, %v1954_v15, 4286644096 }
 0x4dd   :  { %v2023_v60 = vmax.bf16 %v2021_v26, %v2015_v47 }
 0x4df   :  { %v2028_v44 = vmax.bf16 %v2027_v49, %v2023_v60 }
 0x4e1   :  { %v2029_v28 = vunpack.i.l.bf16 %v2028_v44  ;;  %v2030_v31 = vunpack.i.h.bf16 %v2028_v44 }
 0x4e3   :  { %v2031_v2 = vmax.f32 %v2029_v28, %v2030_v31 }
 0x4e5   :  { %v2032_v4 = vrot.slane %v2031_v2, 4 }
 0x4e7   :  { %v2033_v42 = vmax.f32 %v2031_v2, %v2032_v4 }
 0x4e9   :  { %v2034_v21 = vrot.slane %v2033_v42, 2 }
 0x4eb   :  { %v2035_v36 = vmax.f32 %v2033_v42, %v2034_v21 }
 0x4ed   :  { %v2036_v62 = vrot.slane %v2035_v36, 1 }
 0x4ef   :  { %v2037_v51 = vmax.f32 %v2035_v36, %v2036_v62 }
 0x4f1   :  { %v2038_v43 = vpack.i.bf16 %v2037_v51, %v2037_v51 }
 0x4f3   :  { %v2050_v58 = vunpack.c.l.b16 %v2038_v43 }
 0x4f5   :  { %v2051_v9 = vsel %vm1432_vm1, %v2050_v58, %v2049_v56 }
 0x4f6   :  { %v2052_v19 = vpack.c.b16 %v2051_v9, %v2051_v9 }
 0x4f8   :  { %2422 = vmatmul.mubr.msk.bf16.vlgmr.msra.gmra.mxu0 %vm628_vm0, %v2052_v19 }
 0x4f9   :  { %2426 = vmatpush3.bf16.msra.mxu0 %v2551_v59  ;;  %2433 = vmatprep.mubr.msk.bf16.mxu0 %vm2606_vm2, %v2605_v61 }
 0x4fa   :  { %2427 = vmatprep.subr.bf16.mxu0 %v2605_v61 }
 0x4fd   :  { %2428 = vmatpush3.bf16.msra.mxu0 %v2552_v10 }
 0x4fe   :  { %2429 = vmatprep.subr.bf16.mxu0 %v2605_v61 }
 0x501   :  { %2430 = vmatpush3.bf16.msra.mxu0 %v2553_v41 }
 0x502   :  { %2431 = vmatprep.subr.bf16.mxu0 %v2605_v61  ;;  %v2303_v61 = vld [vmem:[%s3525_s14] ss:$0 sm:$0xff] }
 0x505   :  { %2432 = vmatpush3.bf16.msra.mxu0 %v2554_v38 }
 0x5b8   :  { %v2114_v11 = vpop.f32.mrf.mxu0 }
 0x5b9   :  { %v2120_v18 = vpack.c.bf16 %v2114_v11, %v2114_v11 }
 0x5ba   :  { %v2423_v7 = vpop.f32.mrf.mxu0 }
 0x5bb   :  { %v2130_v53 = vadd.bf16 %v2129_v16, %v2120_v18 }
 0x5bc   :  { %v2117_v32 = vpop.f32.mrf.mxu0 }
 0x5bd   :  { %v2131_v55 = vmax.bf16 %v3553_v1, %v2130_v53 }
 0x5be   :  { %v2424_v24 = vpop.f32.mrf.mxu0 }
 0x5bf   :  { %2434 = vmatmul.mubr.msk.bf16.vlgmr.msra.gmra.mxu0 %vm628_vm0, %v2131_v55 }
 0x67f   :  { %v2208_v29 = vpop.f32.mrf.mxu0 }
 0x680   :  { %v2209_v52 = vadd.f32 %v2303_v61, %v2208_v29 }
 0x681   :  { %v2435_v3 = vpop.f32.mrf.mxu0 }
 0x682   :  { %2214 = vst [vmem:[#allocation5] sm:$0x3] %v2209_v52 }
 0x683   :  { %v2211_v22 = vpop.f32.mrf.mxu0 }
 0x684   :  { %2586 = shalt.err (!%p2583_p9)
}
 0x685   :  { %2224 = dma.vmem_to_hbm [thread:$0]  %s2222_s12, 32, %s3526_s15, [#allocation4]   ;;  %v2436_v1 = vpop.f32.mrf.mxu0 }
 0x686   :  { %2597 = dma.done.wait [#allocation4], 32  }
 0x687   :  { %2598 = vsyncadd [#allocation4], 4294967264 }
 0x688   :  { %2228 = vsyncpa [#allocation3], 1 }
 0x689   :  { %2229 = vsyncpa [#allocation4], 1 }

</bundles_post_ra>
